<compile_context>
chip_gen: v7x
topology: tpu7x:2x2x1
jax: 0.10.0
libtpu: 0.0.40
codegen_flags: <defaults>
</compile_context>

<pallas_src>
import functools

import jax
import jax.numpy as jnp
from jax import lax
from jax.experimental import pallas as pl
from jax.experimental.pallas import tpu as pltpu


# ----------------------------- Pallas kernel --------------------------------
def _fused_kernel(x_ref, w1_ref, w3_ref, p_ref, m_ref, o_ref, *, Cb, BN, W):
    """Single-step fused InvertedResidual (stride=1) on a (C, B*N) block.

    x_ref : (2*Cb, BN) f32   input, channels on sublanes, batch*spatial on lanes
    w1_ref: (Cb, Cb)   f32   1x1 conv #1 weights, BN1 scale folded into rows
    w3_ref: (Cb, Cb)   f32   1x1 conv #2 weights, BN3 scale folded into rows
    p_ref : (Cb, 16)   f32   packed params: col0=b1, col1=b2, col2=b3,
                             cols 3..11 = depthwise taps (BN2 scale folded in)
    m_ref : (9, BN)    f32   per-lane validity mask for each 3x3 tap
    o_ref : (Cb, 2*BN) f32   row i = [x1[i] | branch2_out[i]]  (fused shuffle)
    """
    x1 = x_ref[:Cb, :]                                    # (Cb, BN) passthrough
    x2 = x_ref[Cb:, :]                                    # (Cb, BN) branch2 in

    b1 = p_ref[:, 0:1]
    b2 = p_ref[:, 1:2]
    b3 = p_ref[:, 2:3]

    # ---- 1x1 conv (f32 MXU, HIGHEST) + folded BN (bias only) + ReLU --------
    h = jnp.dot(w1_ref[...], x2, preferred_element_type=jnp.float32,
                precision=lax.Precision.HIGHEST)          # (Cb, BN)
    h = jnp.maximum(h + b1, 0.0)

    # ---- depthwise 3x3, stride 1, pad 1 -------------------------------------
    # A spatial (dy, dx) shift of the per-image (H, W) grid is a lane roll of
    # the flattened (Cb, B*N) tile; invalid taps (image boundaries, including
    # every cross-image wrap of the roll) are zeroed by the per-lane mask.
    # Center tap (k=4, offset 0) seeds the accumulator: no roll, no mask.
    acc = h * p_ref[:, 7:8]
    for k in range(9):
        if k == 4:
            continue
        dy, dx = k // 3 - 1, k % 3 - 1
        off = dy * W + dx                                  # flattened lane offset
        shifted = pltpu.roll(h, shift=(-off) % BN, axis=1)
        acc = acc + (shifted * m_ref[k:k + 1, :]) * p_ref[:, 3 + k:4 + k]
    h2 = acc + b2                                          # BN2 (scale folded)

    # ---- 1x1 conv (f32 MXU, HIGHEST) + folded BN (bias only) + ReLU --------
    h3 = jnp.dot(w3_ref[...], h2, preferred_element_type=jnp.float32,
                 precision=lax.Precision.HIGHEST)
    h3 = jnp.maximum(h3 + b3, 0.0)

    # ---- fused concat + channel_shuffle(groups=2) ---------------------------
    # Output row i flattens to channels (2i, 2i+1) = (x1[i], branch2[i]).
    # Both halves start at lane offsets that are multiples of 128 -> dense vst.
    o_ref[:, :BN] = x1
    o_ref[:, BN:] = h3.astype(o_ref.dtype)


def _make_dw_masks(H, W):
    """(9, H*W) f32 validity masks for the 3x3 depthwise taps of one image."""
    N = H * W
    ys = jnp.arange(N, dtype=jnp.int32) // W
    xs = jnp.arange(N, dtype=jnp.int32) % W
    rows = []
    for dy in (-1, 0, 1):
        for dx in (-1, 0, 1):
            ok = ((ys + dy >= 0) & (ys + dy < H) &
                  (xs + dx >= 0) & (xs + dx < W))
            rows.append(ok.astype(jnp.float32))
    return jnp.stack(rows, axis=0)                         # (9, N)


def inverted_residual_forward(x_nchw, kernel_params, stride=1):
    """stride==1 forward path of InvertedResidual (requires inp == oup)."""
    if stride != 1:
        # TODO(synk): stride>1 constructor variant (branch1 + strided depthwise)
        # not implemented in this synthetic kernel.
        raise NotImplementedError("only the stride==1 path is implemented")
    B, C, H, W = x_nchw.shape
    Cb = C // 2
    N = H * W
    BN = B * N
    kp = kernel_params

    # Per-image masks tiled across the batch-folded lane axis (lane = b*N + n).
    masks = jnp.tile(_make_dw_masks(H, W), (1, B))         # (9, B*N)
    # Working layout: channels on sublanes, (batch, spatial) flattened on lanes.
    x_cbn = jnp.transpose(x_nchw.reshape(B, C, N), (1, 0, 2)).reshape(C, BN)

    kernel = functools.partial(_fused_kernel, Cb=Cb, BN=BN, W=W)
    full = lambda i: (0, 0)
    out = pl.pallas_call(
        kernel,
        out_shape=jax.ShapeDtypeStruct((Cb, 2 * BN), x_cbn.dtype),
        grid_spec=pltpu.PrefetchScalarGridSpec(
            num_scalar_prefetch=0,
            grid=(1,),                                     # single step
            in_specs=[
                pl.BlockSpec((C, BN), full),               # x  (C, B*N)
                pl.BlockSpec((Cb, Cb), full),              # w1 (BN1 scale folded)
                pl.BlockSpec((Cb, Cb), full),              # w3 (BN3 scale folded)
                pl.BlockSpec((Cb, 16), full),              # packed biases + taps
                pl.BlockSpec((9, BN), full),               # tap masks
            ],
            out_specs=pl.BlockSpec((Cb, 2 * BN), full),
        ),
        compiler_params=pltpu.CompilerParams(
            dimension_semantics=("arbitrary",)),
    )(x_cbn, kp["w1"], kp["w3"], kp["p"], masks)

    # Row i of (Cb, 2, B, N) holds output channels (2i, 2i+1) = (x1_i, b2_i);
    # this small reshape/transpose realizes channel_shuffle(groups=2).
    return out.reshape(Cb, 2, B, N).transpose(2, 0, 1, 3).reshape(B, C, H, W)


# --------------------------- parameters ------------------------------------
def make_params(key, Cb):
    ks = jax.random.split(key, 3)
    w1 = jax.random.normal(ks[0], (Cb, Cb, 1, 1), jnp.float32) * 0.3   # OIHW
    wdw = jax.random.normal(ks[1], (Cb, 1, 3, 3), jnp.float32) * 0.3   # depthwise
    w3 = jax.random.normal(ks[2], (Cb, Cb, 1, 1), jnp.float32) * 0.3   # OIHW
    idx = jnp.arange(Cb, dtype=jnp.float32)

    def bn_params(off):
        gamma = 1.0 + 0.05 * idx + off
        beta = 0.02 * idx - off
        mean = 0.1 * jnp.sin(idx + off)
        var = 0.5 + 0.03 * idx
        return gamma, beta, mean, var

    bn1, bn2, bn3 = bn_params(0.0), bn_params(0.1), bn_params(0.2)
    raw = dict(w1_oihw=w1, wdw_oihw=wdw, w3_oihw=w3, bn1=bn1, bn2=bn2, bn3=bn3)

    def fold(bn, eps=1e-5):
        g, b, m, v = bn
        s = g / jnp.sqrt(v + eps)
        return s, b - m * s

    s1, b1 = fold(bn1)
    s2, b2 = fold(bn2)
    s3, b3 = fold(bn3)

    # Fold BN scales into the weights on the host, in f32:
    #   s * (W @ x) + b == (s[:,None] * W) @ x + b            (1x1 convs)
    #   s2 * sum_k wdw_k * shift_k == sum_k (s2*wdw_k) * shift_k  (depthwise)
    w1_f = w1[:, :, 0, 0] * s1[:, None]                    # (Cout, Cin) f32
    w3_f = w3[:, :, 0, 0] * s3[:, None]
    wdw_taps = wdw[:, 0].reshape(Cb, 9) * s2[:, None]      # (Cb, 9), tap k = ky*3+kx

    # Single packed (Cb, 16) parameter block -> one small DMA instead of eight.
    #   col 0 = b1, col 1 = b2, col 2 = b3, cols 3..11 = depthwise taps 0..8
    p = jnp.zeros((Cb, 16), jnp.float32)
    p = p.at[:, 0].set(b1).at[:, 1].set(b2).at[:, 2].set(b3)
    p = p.at[:, 3:12].set(wdw_taps)

    kernel_params = dict(w1=w1_f, w3=w3_f, p=p)
    return raw, kernel_params


# --------------------------- pure-JAX reference -----------------------------
def _bn_nchw(x, gamma, beta, mean, var, eps=1e-5):
    s = gamma / jnp.sqrt(var + eps)
    b = beta - mean * s
    return x * s[None, :, None, None] + b[None, :, None, None]


def ref_inverted_residual_stride1(x, p):
    B, C, H, W = x.shape
    Cb = C // 2
    x1, x2 = x[:, :Cb], x[:, Cb:]
    dn = ("NCHW", "OIHW", "NCHW")
    hi = lax.Precision.HIGHEST
    h = lax.conv_general_dilated(x2, p["w1_oihw"], (1, 1), ((0, 0), (0, 0)),
                                 dimension_numbers=dn, precision=hi)
    h = jax.nn.relu(_bn_nchw(h, *p["bn1"]))
    h = lax.conv_general_dilated(h, p["wdw_oihw"], (1, 1), ((1, 1), (1, 1)),
                                 dimension_numbers=dn,
                                 feature_group_count=Cb, precision=hi)
    h = _bn_nchw(h, *p["bn2"])
    h = lax.conv_general_dilated(h, p["w3_oihw"], (1, 1), ((0, 0), (0, 0)),
                                 dimension_numbers=dn, precision=hi)
    h = jax.nn.relu(_bn_nchw(h, *p["bn3"]))
    out = jnp.concatenate([x1, h], axis=1)
    out = out.reshape(B, 2, Cb, H, W).transpose(0, 2, 1, 3, 4).reshape(B, C, H, W)
    return out


if __name__ == "__main__":
    key = jax.random.PRNGKey(0)
    kx, kparam = jax.random.split(key)

    # InvertedResidual(inp=32, oup=32, stride=1): branch_features = 16
    B, C, H, W = 2, 32, 16, 16
    Cb = C // 2
    x = jax.random.uniform(kx, (B, C, H, W), jnp.float32, minval=-1.0, maxval=1.0)
    raw_params, kernel_params = make_params(kparam, Cb)

    out = inverted_residual_forward(x, kernel_params, stride=1)
    out = jax.block_until_ready(out)

    ref = ref_inverted_residual_stride1(x, raw_params)
    assert out.shape == (B, C, H, W)
    # All matmuls are f32/HIGHEST and element-wise math is f32, so the
    # tolerance is tight again; any structural bug (bad roll, mask, or shuffle
    # placement) produces O(1) errors.
    err = float(jnp.max(jnp.abs(out - ref)))
    assert jnp.allclose(out, ref, atol=1e-3, rtol=1e-3), err

    print("KERNEL_OK")
</pallas_src>

<mosaic_0001>
module attributes {stable_mosaic.version = 11 : i64} {
  func.func @_fused_kernel(%arg0: i32, %arg1: memref<32x512xf32, #tpu.memory_space<vmem>>, %arg2: memref<16x16xf32, #tpu.memory_space<vmem>>, %arg3: memref<16x16xf32, #tpu.memory_space<vmem>>, %arg4: memref<16x16xf32, #tpu.memory_space<vmem>>, %arg5: memref<9x512xf32, #tpu.memory_space<vmem>>, %arg6: memref<16x1024xf32, #tpu.memory_space<vmem>>) attributes {dimension_semantics = [#tpu.dimension_semantics<arbitrary>], iteration_bounds = array<i64: 1>, scalar_prefetch = 0 : i64, scratch_operands = 0 : i64, tpu.core_type = #tpu.core_type<tc>, window_params = [{pipeline_mode = #tpu.pipeline_mode<synchronous>, transform_indices = @transform_0, window_bounds = array<i64: 32, 512>}, {pipeline_mode = #tpu.pipeline_mode<synchronous>, transform_indices = @transform_1, window_bounds = array<i64: 16, 16>}, {pipeline_mode = #tpu.pipeline_mode<synchronous>, transform_indices = @transform_2, window_bounds = array<i64: 16, 16>}, {pipeline_mode = #tpu.pipeline_mode<synchronous>, transform_indices = @transform_3, window_bounds = array<i64: 16, 16>}, {pipeline_mode = #tpu.pipeline_mode<synchronous>, transform_indices = @transform_4, window_bounds = array<i64: 9, 512>}, {pipeline_mode = #tpu.pipeline_mode<synchronous>, transform_indices = @transform_5, window_bounds = array<i64: 16, 1024>}]} {
    %c0 = arith.constant 0 : index
    %c0_0 = arith.constant 0 : index
    %0 = vector.load %arg1[%c0, %c0_0] : memref<32x512xf32, #tpu.memory_space<vmem>>, vector<16x512xf32>
    %c16 = arith.constant 16 : index
    %c0_1 = arith.constant 0 : index
    %1 = vector.load %arg1[%c16, %c0_1] : memref<32x512xf32, #tpu.memory_space<vmem>>, vector<16x512xf32>
    %c0_2 = arith.constant 0 : index
    %c0_3 = arith.constant 0 : index
    %2 = vector.load %arg4[%c0_2, %c0_3] : memref<16x16xf32, #tpu.memory_space<vmem>>, vector<16x1xf32>
    %c0_4 = arith.constant 0 : index
    %c1 = arith.constant 1 : index
    %3 = vector.load %arg4[%c0_4, %c1] : memref<16x16xf32, #tpu.memory_space<vmem>>, vector<16x1xf32>
    %c0_5 = arith.constant 0 : index
    %c2 = arith.constant 2 : index
    %4 = vector.load %arg4[%c0_5, %c2] : memref<16x16xf32, #tpu.memory_space<vmem>>, vector<16x1xf32>
    %c0_6 = arith.constant 0 : index
    %c0_7 = arith.constant 0 : index
    %5 = vector.load %arg2[%c0_6, %c0_7] : memref<16x16xf32, #tpu.memory_space<vmem>>, vector<16x16xf32>
    %cst = arith.constant dense<0.000000e+00> : vector<16x512xf32>
    %6 = tpu.matmul %5, %1, %cst {dimension_numbers = #tpu.dot_dimension_numbers<[1], [0], [0], [1], [0, 0, 1, 1], [], []>, precision = #tpu.contract_precision<fp32>} : vector<16x16xf32>, vector<16x512xf32>, vector<16x512xf32> -> vector<16x512xf32>
    %7 = vector.broadcast %2 : vector<16x1xf32> to vector<16x512xf32>
    %8 = arith.addf %6, %7 : vector<16x512xf32>
    %cst_8 = arith.constant 0.000000e+00 : f32
    %9 = vector.broadcast %cst_8 : f32 to vector<16x512xf32>
    %10 = arith.maximumf %8, %9 : vector<16x512xf32>
    %c0_9 = arith.constant 0 : index
    %c7 = arith.constant 7 : index
    %11 = vector.load %arg4[%c0_9, %c7] : memref<16x16xf32, #tpu.memory_space<vmem>>, vector<16x1xf32>
    %12 = vector.broadcast %11 : vector<16x1xf32> to vector<16x512xf32>
    %13 = arith.mulf %10, %12 : vector<16x512xf32>
    %c17_i32 = arith.constant 17 : i32
    %14 = tpu.dynamic_rotate %10 by %c17_i32 dim 1 : vector<16x512xf32>, i32 -> vector<16x512xf32>
    %c0_10 = arith.constant 0 : index
    %c0_11 = arith.constant 0 : index
    %15 = vector.load %arg5[%c0_10, %c0_11] : memref<9x512xf32, #tpu.memory_space<vmem>>, vector<1x512xf32>
    %16 = vector.broadcast %15 : vector<1x512xf32> to vector<16x512xf32>
    %17 = arith.mulf %14, %16 : vector<16x512xf32>
    %c0_12 = arith.constant 0 : index
    %c3 = arith.constant 3 : index
    %18 = vector.load %arg4[%c0_12, %c3] : memref<16x16xf32, #tpu.memory_space<vmem>>, vector<16x1xf32>
    %19 = vector.broadcast %18 : vector<16x1xf32> to vector<16x512xf32>
    %20 = arith.mulf %17, %19 : vector<16x512xf32>
    %21 = arith.addf %13, %20 : vector<16x512xf32>
    %c16_i32 = arith.constant 16 : i32
    %22 = tpu.dynamic_rotate %10 by %c16_i32 dim 1 : vector<16x512xf32>, i32 -> vector<16x512xf32>
    %c1_13 = arith.constant 1 : index
    %c0_14 = arith.constant 0 : index
    %23 = vector.load %arg5[%c1_13, %c0_14] : memref<9x512xf32, #tpu.memory_space<vmem>>, vector<1x512xf32>
    %24 = vector.broadcast %23 : vector<1x512xf32> to vector<16x512xf32>
    %25 = arith.mulf %22, %24 : vector<16x512xf32>
    %c0_15 = arith.constant 0 : index
    %c4 = arith.constant 4 : index
    %26 = vector.load %arg4[%c0_15, %c4] : memref<16x16xf32, #tpu.memory_space<vmem>>, vector<16x1xf32>
    %27 = vector.broadcast %26 : vector<16x1xf32> to vector<16x512xf32>
    %28 = arith.mulf %25, %27 : vector<16x512xf32>
    %29 = arith.addf %21, %28 : vector<16x512xf32>
    %c15_i32 = arith.constant 15 : i32
    %30 = tpu.dynamic_rotate %10 by %c15_i32 dim 1 : vector<16x512xf32>, i32 -> vector<16x512xf32>
    %c2_16 = arith.constant 2 : index
    %c0_17 = arith.constant 0 : index
    %31 = vector.load %arg5[%c2_16, %c0_17] : memref<9x512xf32, #tpu.memory_space<vmem>>, vector<1x512xf32>
    %32 = vector.broadcast %31 : vector<1x512xf32> to vector<16x512xf32>
    %33 = arith.mulf %30, %32 : vector<16x512xf32>
    %c0_18 = arith.constant 0 : index
    %c5 = arith.constant 5 : index
    %34 = vector.load %arg4[%c0_18, %c5] : memref<16x16xf32, #tpu.memory_space<vmem>>, vector<16x1xf32>
    %35 = vector.broadcast %34 : vector<16x1xf32> to vector<16x512xf32>
    %36 = arith.mulf %33, %35 : vector<16x512xf32>
    %37 = arith.addf %29, %36 : vector<16x512xf32>
    %c1_i32 = arith.constant 1 : i32
    %38 = tpu.dynamic_rotate %10 by %c1_i32 dim 1 : vector<16x512xf32>, i32 -> vector<16x512xf32>
    %c3_19 = arith.constant 3 : index
    %c0_20 = arith.constant 0 : index
    %39 = vector.load %arg5[%c3_19, %c0_20] : memref<9x512xf32, #tpu.memory_space<vmem>>, vector<1x512xf32>
    %40 = vector.broadcast %39 : vector<1x512xf32> to vector<16x512xf32>
    %41 = arith.mulf %38, %40 : vector<16x512xf32>
    %c0_21 = arith.constant 0 : index
    %c6 = arith.constant 6 : index
    %42 = vector.load %arg4[%c0_21, %c6] : memref<16x16xf32, #tpu.memory_space<vmem>>, vector<16x1xf32>
    %43 = vector.broadcast %42 : vector<16x1xf32> to vector<16x512xf32>
    %44 = arith.mulf %41, %43 : vector<16x512xf32>
    %45 = arith.addf %37, %44 : vector<16x512xf32>
    %c511_i32 = arith.constant 511 : i32
    %46 = tpu.dynamic_rotate %10 by %c511_i32 dim 1 : vector<16x512xf32>, i32 -> vector<16x512xf32>
    %c5_22 = arith.constant 5 : index
    %c0_23 = arith.constant 0 : index
    %47 = vector.load %arg5[%c5_22, %c0_23] : memref<9x512xf32, #tpu.memory_space<vmem>>, vector<1x512xf32>
    %48 = vector.broadcast %47 : vector<1x512xf32> to vector<16x512xf32>
    %49 = arith.mulf %46, %48 : vector<16x512xf32>
    %c0_24 = arith.constant 0 : index
    %c8 = arith.constant 8 : index
    %50 = vector.load %arg4[%c0_24, %c8] : memref<16x16xf32, #tpu.memory_space<vmem>>, vector<16x1xf32>
    %51 = vector.broadcast %50 : vector<16x1xf32> to vector<16x512xf32>
    %52 = arith.mulf %49, %51 : vector<16x512xf32>
    %53 = arith.addf %45, %52 : vector<16x512xf32>
    %c497_i32 = arith.constant 497 : i32
    %54 = tpu.dynamic_rotate %10 by %c497_i32 dim 1 : vector<16x512xf32>, i32 -> vector<16x512xf32>
    %c6_25 = arith.constant 6 : index
    %c0_26 = arith.constant 0 : index
    %55 = vector.load %arg5[%c6_25, %c0_26] : memref<9x512xf32, #tpu.memory_space<vmem>>, vector<1x512xf32>
    %56 = vector.broadcast %55 : vector<1x512xf32> to vector<16x512xf32>
    %57 = arith.mulf %54, %56 : vector<16x512xf32>
    %c0_27 = arith.constant 0 : index
    %c9 = arith.constant 9 : index
    %58 = vector.load %arg4[%c0_27, %c9] : memref<16x16xf32, #tpu.memory_space<vmem>>, vector<16x1xf32>
    %59 = vector.broadcast %58 : vector<16x1xf32> to vector<16x512xf32>
    %60 = arith.mulf %57, %59 : vector<16x512xf32>
    %61 = arith.addf %53, %60 : vector<16x512xf32>
    %c496_i32 = arith.constant 496 : i32
    %62 = tpu.dynamic_rotate %10 by %c496_i32 dim 1 : vector<16x512xf32>, i32 -> vector<16x512xf32>
    %c7_28 = arith.constant 7 : index
    %c0_29 = arith.constant 0 : index
    %63 = vector.load %arg5[%c7_28, %c0_29] : memref<9x512xf32, #tpu.memory_space<vmem>>, vector<1x512xf32>
    %64 = vector.broadcast %63 : vector<1x512xf32> to vector<16x512xf32>
    %65 = arith.mulf %62, %64 : vector<16x512xf32>
    %c0_30 = arith.constant 0 : index
    %c10 = arith.constant 10 : index
    %66 = vector.load %arg4[%c0_30, %c10] : memref<16x16xf32, #tpu.memory_space<vmem>>, vector<16x1xf32>
    %67 = vector.broadcast %66 : vector<16x1xf32> to vector<16x512xf32>
    %68 = arith.mulf %65, %67 : vector<16x512xf32>
    %69 = arith.addf %61, %68 : vector<16x512xf32>
    %c495_i32 = arith.constant 495 : i32
    %70 = tpu.dynamic_rotate %10 by %c495_i32 dim 1 : vector<16x512xf32>, i32 -> vector<16x512xf32>
    %c8_31 = arith.constant 8 : index
    %c0_32 = arith.constant 0 : index
    %71 = vector.load %arg5[%c8_31, %c0_32] : memref<9x512xf32, #tpu.memory_space<vmem>>, vector<1x512xf32>
    %72 = vector.broadcast %71 : vector<1x512xf32> to vector<16x512xf32>
    %73 = arith.mulf %70, %72 : vector<16x512xf32>
    %c0_33 = arith.constant 0 : index
    %c11 = arith.constant 11 : index
    %74 = vector.load %arg4[%c0_33, %c11] : memref<16x16xf32, #tpu.memory_space<vmem>>, vector<16x1xf32>
    %75 = vector.broadcast %74 : vector<16x1xf32> to vector<16x512xf32>
    %76 = arith.mulf %73, %75 : vector<16x512xf32>
    %77 = arith.addf %69, %76 : vector<16x512xf32>
    %78 = vector.broadcast %3 : vector<16x1xf32> to vector<16x512xf32>
    %79 = arith.addf %77, %78 : vector<16x512xf32>
    %c0_34 = arith.constant 0 : index
    %c0_35 = arith.constant 0 : index
    %80 = vector.load %arg3[%c0_34, %c0_35] : memref<16x16xf32, #tpu.memory_space<vmem>>, vector<16x16xf32>
    %cst_36 = arith.constant dense<0.000000e+00> : vector<16x512xf32>
    %81 = tpu.matmul %80, %79, %cst_36 {dimension_numbers = #tpu.dot_dimension_numbers<[1], [0], [0], [1], [0, 0, 1, 1], [], []>, precision = #tpu.contract_precision<fp32>} : vector<16x16xf32>, vector<16x512xf32>, vector<16x512xf32> -> vector<16x512xf32>
    %82 = vector.broadcast %4 : vector<16x1xf32> to vector<16x512xf32>
    %83 = arith.addf %81, %82 : vector<16x512xf32>
    %cst_37 = arith.constant 0.000000e+00 : f32
    %84 = vector.broadcast %cst_37 : f32 to vector<16x512xf32>
    %85 = arith.maximumf %83, %84 : vector<16x512xf32>
    %c0_38 = arith.constant 0 : index
    %c0_39 = arith.constant 0 : index
    %86 = vector.load %arg6[%c0_38, %c0_39] : memref<16x1024xf32, #tpu.memory_space<vmem>>, vector<16x512xf32>
    tpu.vector_store %arg6[%c0_38, %c0_39], %0 {strides = array<i32>} : memref<16x1024xf32, #tpu.memory_space<vmem>>, vector<16x512xf32>,
    %c0_40 = arith.constant 0 : index
    %c512 = arith.constant 512 : index
    %87 = vector.load %arg6[%c0_40, %c512] : memref<16x1024xf32, #tpu.memory_space<vmem>>, vector<16x512xf32>
    tpu.vector_store %arg6[%c0_40, %c512], %85 {strides = array<i32>} : memref<16x1024xf32, #tpu.memory_space<vmem>>, vector<16x512xf32>,
    return
  }
  func.func @transform_0(%arg0: i32) -> (i32, i32) {
    %c0_i32 = arith.constant 0 : i32
    %c0_i32_0 = arith.constant 0 : i32
    %c0_i32_1 = arith.constant 0 : i32
    return %c0_i32, %c0_i32_0 : i32, i32
  }
  func.func @transform_1(%arg0: i32) -> (i32, i32) {
    %c0_i32 = arith.constant 0 : i32
    %c0_i32_0 = arith.constant 0 : i32
    %c0_i32_1 = arith.constant 0 : i32
    return %c0_i32, %c0_i32_0 : i32, i32
  }
  func.func @transform_2(%arg0: i32) -> (i32, i32) {
    %c0_i32 = arith.constant 0 : i32
    %c0_i32_0 = arith.constant 0 : i32
    %c0_i32_1 = arith.constant 0 : i32
    return %c0_i32, %c0_i32_0 : i32, i32
  }
  func.func @transform_3(%arg0: i32) -> (i32, i32) {
    %c0_i32 = arith.constant 0 : i32
    %c0_i32_0 = arith.constant 0 : i32
    %c0_i32_1 = arith.constant 0 : i32
    return %c0_i32, %c0_i32_0 : i32, i32
  }
  func.func @transform_4(%arg0: i32) -> (i32, i32) {
    %c0_i32 = arith.constant 0 : i32
    %c0_i32_0 = arith.constant 0 : i32
    %c0_i32_1 = arith.constant 0 : i32
    return %c0_i32, %c0_i32_0 : i32, i32
  }
  func.func @transform_5(%arg0: i32) -> (i32, i32) {
    %c0_i32 = arith.constant 0 : i32
    %c0_i32_0 = arith.constant 0 : i32
    %c0_i32_1 = arith.constant 0 : i32
    return %c0_i32, %c0_i32_0 : i32, i32
  }
}

</mosaic_0001>

<bundles_post_ra>
// kernel: tpu_custom_call.1
= control target key start
LH: loop header
LB: loop body
LE: loop exit
PB: predicated region body
PF: predicated region fallthrough
CT: control target
= control target key end

     0   :  { %10 = vsyncpa [#allocation3], 0  ;;  %s4591_s0 = inlined_call_operand.hbm [shape: f32[32,512], index: 0, kind: input, shape index: {}]   ;;  %s4592_s1 = inlined_call_operand.hbm [shape: f32[16,16], index: 1, kind: input, shape index: {}]   ;;  %s4593_s2 = inlined_call_operand.hbm [shape: f32[16,16], index: 2, kind: input, shape index: {}]   ;;  %s4594_s3 = inlined_call_operand.hbm [shape: f32[16,16], index: 3, kind: input, shape index: {}]   ;;  %s4595_s4 = inlined_call_operand.hbm [shape: f32[9,512], index: 4, kind: input, shape index: {}]   ;;  %s4596_s5 = inlined_call_operand.hbm [shape: f32[16,1024], index: 5, kind: output, shape index: {}]  }
   0x1   :  { %11 = vsyncpa [#allocation6], 0 }
   0x2   :  { %12 = vsyncpa [#allocation9], 0 }
   0x3   :  { %13 = vsyncpa [#allocation4], 0  ;;  %s3415_s18 = smov [#allocation5]   ;;  %s3275_s22 = scalar_lea.hbm %s4592_s1, 256 }
   0x4   :  { %s31_s19 = sshll.u32 %s3415_s18, 4  ;;  %p3276_p0 = scmp.ne.s32.totalorder %s4592_s1, %s3275_s22  ;;  %s32_s19 = int_to_ptr.vmem [resolvable:$true] %s31_s19 }
   0x5   :  { %p3279_p1 = scmp.lt.u32.totalorder %s3275_s22, %s4592_s1 }
   0x7   :  { %p3281_p2 = pnand %p3279_p1, %p3276_p0 }
   0x9   :  { %3284 = shalt.err (!%p3281_p2)
}
   0xa   :  { %s3285_s27 = scalar_lea.vmem %s32_s19, 256  ;;  %p3290_p4 = scmp.lt.s32.totalorder %s32_s19, %s32_s19 }
   0xb   :  { %p3286_p3 = scmp.ne.s32.totalorder %s32_s19, %s3285_s27  ;;  %p3291_p5 = scmp.lt.s32.totalorder %s3285_s27, %s3285_s27 }
   0xd   :  { %p3292_p6 = por %p3291_p5, %p3290_p4 }
   0xf   :  { %p3293_p7 = pnand %p3292_p6, %p3286_p3 }
  0x11   :  { %3296 = shalt.err (!%p3293_p7)
}
  0x12   :  { %s3416_s28 = smov 128   ;;  %s3417_s29 = smov 8  }
  0x13   :  { %37 = dma.hbm_to_vmem [thread:$0]  %s4592_s1, 256, %s32_s19, [#allocation6], %s3416_s28, %s3416_s28, %s3417_s29  }
  0x14   :  { %s3418_s7 = smov [#allocation8]   ;;  %s3419_s9 = smov [#allocation2]  }
  0x15   :  { %s55_s8 = sshll.u32 %s3418_s7, 4  ;;  %s19_s10 = sshll.u32 %s3419_s9, 4  ;;  %s56_s8 = int_to_ptr.vmem [resolvable:$true] %s55_s8  ;;  %s20_s10 = int_to_ptr.vmem [resolvable:$true] %s19_s10 }
  0x16   :  { %s3297_s13 = scalar_lea.hbm %s4594_s3, 256 }
  0x17   :  { %p3298_p8 = scmp.ne.s32.totalorder %s4594_s3, %s3297_s13  ;;  %p3301_p9 = scmp.lt.u32.totalorder %s3297_s13, %s4594_s3 }
  0x19   :  { %p3303_p10 = pnand %p3301_p9, %p3298_p8 }
  0x1b   :  { %3306 = shalt.err (!%p3303_p10)
}
  0x1c   :  { %s3307_s1 = scalar_lea.vmem %s56_s8, 256  ;;  %p3312_p12 = scmp.lt.s32.totalorder %s56_s8, %s56_s8 }
  0x1d   :  { %p3308_p11 = scmp.ne.s32.totalorder %s56_s8, %s3307_s1  ;;  %p3313_p13 = scmp.lt.s32.totalorder %s3307_s1, %s3307_s1 }
  0x1f   :  { %p3314_p0 = por %p3313_p13, %p3312_p12 }
  0x21   :  { %p3315_p1 = pnand %p3314_p0, %p3308_p11 }
  0x23   :  { %3318 = shalt.err (!%p3315_p1)
}
  0x24   :  { %61 = dma.hbm_to_vmem [thread:$0]  %s4594_s3, 256, %s56_s8, [#allocation9], %s3416_s28, %s3416_s28, %s3417_s29  }
  0x25   :  { %s3319_s22 = scalar_lea.hbm %s4591_s0, 2048 }
  0x26   :  { %p3320_p2 = scmp.ne.s32.totalorder %s4591_s0, %s3319_s22  ;;  %p3323_p3 = scmp.lt.u32.totalorder %s3319_s22, %s4591_s0 }
  0x28   :  { %p3325_p4 = pnand %p3323_p3, %p3320_p2 }
  0x2a   :  { %3328 = shalt.err (!%p3325_p4)
}
  0x2b   :  { %s3329_s27 = scalar_lea.vmem %s20_s10, 2048  ;;  %p3334_p6 = scmp.lt.s32.totalorder %s20_s10, %s20_s10 }
  0x2c   :  { %p3330_p5 = scmp.ne.s32.totalorder %s20_s10, %s3329_s27  ;;  %p3335_p7 = scmp.lt.s32.totalorder %s3329_s27, %s3329_s27 }
  0x2e   :  { %p3336_p8 = por %p3335_p7, %p3334_p6 }
  0x30   :  { %p3337_p9 = pnand %p3336_p8, %p3330_p5 }
  0x32   :  { %3340 = shalt.err (!%p3337_p9)
}
  0x33   :  { %s3420_s3 = smov 512   ;;  %s3421_s30 = smov 32  }
  0x34   :  { %25 = dma.hbm_to_vmem [thread:$0]  %s4591_s0, 2048, %s20_s10, [#allocation3], %s3420_s3, %s3420_s3, %s3421_s30  }
  0x35   :  { %s3422_s8 = smov [#allocation7]   ;;  %s3423_s11 = smov [#allocation10]  }
  0x36   :  { %s43_s9 = sshll.u32 %s3422_s8, 4  ;;  %s67_s12 = sshll.u32 %s3423_s11, 4  ;;  %s44_s9 = int_to_ptr.vmem [resolvable:$true] %s43_s9  ;;  %s68_s12 = int_to_ptr.vmem [resolvable:$true] %s67_s12 }
  0x37   :  { %s3341_s15 = scalar_lea.hbm %s4593_s2, 256 }
  0x38   :  { %p3342_p10 = scmp.ne.s32.totalorder %s4593_s2, %s3341_s15  ;;  %p3345_p11 = scmp.lt.u32.totalorder %s3341_s15, %s4593_s2 }
  0x3a   :  { %p3347_p12 = pnand %p3345_p11, %p3342_p10 }
  0x3c   :  { %3350 = shalt.err (!%p3347_p12)
}
  0x3d   :  { %s3351_s0 = scalar_lea.vmem %s44_s9, 256  ;;  %p3356_p0 = scmp.lt.s32.totalorder %s44_s9, %s44_s9 }
  0x3e   :  { %p3352_p13 = scmp.ne.s32.totalorder %s44_s9, %s3351_s0  ;;  %p3357_p1 = scmp.lt.s32.totalorder %s3351_s0, %s3351_s0 }
  0x40   :  { %p3358_p2 = por %p3357_p1, %p3356_p0 }
  0x42   :  { %p3359_p3 = pnand %p3358_p2, %p3352_p13 }
  0x44   :  { %3362 = shalt.err (!%p3359_p3)
}
  0x45   :  { %49 = dma.hbm_to_vmem [thread:$0]  %s4593_s2, 256, %s44_s9, [#allocation6], %s3416_s28, %s3416_s28, %s3417_s29  }
  0x46   :  { %s3363_s22 = scalar_lea.hbm %s4595_s4, 1024 }
  0x47   :  { %p3364_p4 = scmp.ne.s32.totalorder %s4595_s4, %s3363_s22  ;;  %p3367_p5 = scmp.lt.u32.totalorder %s3363_s22, %s4595_s4 }
  0x49   :  { %p3369_p6 = pnand %p3367_p5, %p3364_p4 }
  0x4b   :  { %3372 = shalt.err (!%p3369_p6)
}
  0x4c   :  { %s3373_s27 = scalar_lea.vmem %s68_s12, 1024  ;;  %p3378_p8 = scmp.lt.s32.totalorder %s68_s12, %s68_s12 }
  0x4d   :  { %p3374_p7 = scmp.ne.s32.totalorder %s68_s12, %s3373_s27  ;;  %p3379_p9 = scmp.lt.s32.totalorder %s3373_s27, %s3373_s27 }
  0x4f   :  { %p3380_p10 = por %p3379_p9, %p3378_p8 }
  0x51   :  { %p3381_p11 = pnand %p3380_p10, %p3374_p7 }
  0x53   :  { %3384 = shalt.err (!%p3381_p11)
}
  0x54   :  { %73 = dma.hbm_to_vmem [thread:$0]  %s4595_s4, 1024, %s68_s12, [#allocation9], %s3420_s3, %s3420_s3, %s3421_s30  }
  0x55   :  { %3407 = dma.done.wait [#allocation3], 2048  }
  0x56   :  { %3408 = vsyncadd [#allocation3], 4294965248 }
  0x57   :  { %3409 = dma.done.wait [#allocation6], 512  }
  0x58   :  { %3410 = vsyncadd [#allocation6], 4294966784 }
  0x59   :  { %3411 = dma.done.wait [#allocation9], 1280  }
  0x5a   :  { %3412 = vsyncadd [#allocation9], 4294966016  ;;  %v4597_v0 = vmov 0.0   ;;  %v3425_v1 = vmov 0   ;;  %v3426_v2 = vmov 7   ;;  %v98_v3 = vld [vmem:[#allocation2 + $0x48] sm:$0xff] }
  0x5b   :  { %194 = vmatprep.mubr.f32.mxu0 %v4597_v0  ;;  %734 = vmatprep.mubr.f32.mxu1 %v4597_v0  ;;  %v102_v4 = vld [vmem:[#allocation2 + $0x68] sm:$0xff]  ;;  %v100_v5 = vld [vmem:[#allocation2 + $0x58] sm:$0xff]  ;;  %vm119_vm0 = vcmask 130048   ;;  %v126_v6 = vand.u32 4294901760, %v98_v3  ;;  %v97_v10 = vld [vmem:[#allocation2 + $0x40] sm:$0xff]  ;;  %v3427_v61 = vmov 3  }
  0x5c   :  { %3251 = vset.pattern.permute.xlu0 %v3425_v1  ;;  %3252 = vset.pattern.permute.xlu1 %v3426_v2  ;;  %v130_v7 = vand.u32 4294901760, %v102_v4  ;;  %v104_v8 = vld [vmem:[#allocation2 + $0x78] sm:$0xff]  ;;  %v666_v9 = vand.u32 4294901760, %v100_v5  ;;  %v101_v11 = vld [vmem:[#allocation2 + $0x60] sm:$0xff]  ;;  %v128_v13 = vand.u32 4294901760, %v97_v10  ;;  %v99_v15 = vld [vmem:[#allocation2 + $0x50] sm:$0xff] }
  0x5d   :  { %v670_v12 = vand.u32 4294901760, %v104_v8  ;;  %v132_v14 = vand.u32 4294901760, %v101_v11  ;;  %v103_v16 = vld [vmem:[#allocation2 + $0x70] sm:$0xff]  ;;  %v107_v17 = vld [vmem:[#allocation5] sm:$0xff]  ;;  %v3557_v19 = vsub.f32 %v98_v3, %v126_v6  ;;  %v108_v22 = vld [vmem:[#allocation5 + $0x8] sm:$0xff]  ;;  %v668_v29 = vand.u32 4294901760, %v99_v15 }
  0x5e   :  { %v3555_v18 = vpack.c.bf16 %v130_v7, %v126_v6  ;;  %v3559_v20 = vsub.f32 %v102_v4, %v130_v7  ;;  %v3561_v21 = vsub.f32 %v100_v5, %v666_v9  ;;  %v3563_v23 = vld [vmem:[#allocation8] sm:$0xff]  ;;  %v3571_v27 = vsub.f32 %v97_v10, %v128_v13  ;;  %v3578_v32 = vld [vmem:[#allocation8 + $0x8] sm:$0xff]  ;;  %s3436_s4 = smov 17   ;;  %s3437_s29 = smov 16  }
  0x5f   :  { %v3565_v24 = vpack.c.bf16 %v670_v12, %v666_v9  ;;  %v3567_v25 = vsub.f32 %v104_v8, %v670_v12  ;;  %v3569_v26 = vpack.c.bf16 %v132_v14, %v128_v13  ;;  %111 = vperm.xlu0 %3251, %v3563_v23   ;;  %v3575_v28 = vsub.f32 %v101_v11, %v132_v14  ;;  %s3438_s3 = smov 15   ;;  %s3439_s30 = smov 127  }
  0x60   :  { %3027 = vmatprep.subr.bf16.mxu0 %v3555_v18  ;;  %v672_v30 = vand.u32 4294901760, %v103_v16  ;;  %v121_v31 = vsel %vm119_vm0, %v107_v17, 0  ;;  %1215 = vperm.xlu1 %3252, %v3563_v23   ;;  %v124_v34 = vsel %vm119_vm0, %v108_v22, 0  ;;  %v219_v35 = vand.u32 4294901760, %v3557_v19  ;;  %s3440_s6 = smov 112   ;;  %s3441_s7 = smov 1  }
  0x61   :  { %3051 = vmatprep.subr.bf16.mxu1 %v3565_v24  ;;  %3029 = vmatpush1.bf16.msra.mxu0 %v3569_v26  ;;  %v3583_v33 = vand.u32 4294901760, %v121_v31  ;;  %v231_v36 = vand.u32 4294901760, %v3559_v20  ;;  %v3590_v38 = vsub.f32 %v99_v15, %v668_v29  ;;  %v3594_v40 = vand.u32 4294901760, %v124_v34  ;;  %s3442_s8 = smov 111   ;;  %s3443_s9 = smov 113  }
  0x62   :  { %v3588_v37 = vpack.c.bf16 %v672_v30, %v668_v29  ;;  %v3592_v39 = vsub.f32 %v103_v16, %v672_v30  ;;  %v220_v42 = vsub.f32 %v3557_v19, %v219_v35  ;;  %v759_v44 = vand.u32 4294901760, %v3561_v21  ;;  %s3445_s11 = smov [#allocation11]  }
  0x63   :  { %v3597_v41 = vsub.f32 %v121_v31, %v3583_v33  ;;  %v232_v43 = vsub.f32 %v3559_v20, %v231_v36  ;;  %116 = vperm.xlu0 %3251, %v3578_v32   ;;  %v3609_v45 = vsub.f32 %v124_v34, %v3594_v40  ;;  %v771_v46 = vand.u32 4294901760, %v3567_v25  ;;  %s3012_s12 = sshll.u32 %s3445_s11, 4  ;;  %s3013_s12 = int_to_ptr.vmem [resolvable:$true] %s3012_s12 }
  0x64   :  { %3053 = vmatpush1.bf16.msra.mxu1 %v3588_v37  ;;  %v225_v47 = vand.u32 4294901760, %v3571_v27  ;;  %v237_v48 = vand.u32 4294901760, %v3575_v28  ;;  %1219 = vperm.xlu1 %3252, %v3578_v32   ;;  %v221_v50 = vand.u32 4294901760, %v220_v42  ;;  %v760_v52 = vsub.f32 %v3561_v21, %v759_v44  ;;  %s3385_s13 = scalar_lea.vmem %s3013_s12, 2048  ;;  %p3390_p13 = scmp.lt.s32.totalorder %s3013_s12, %s3013_s12 }
  0x65   :  { %v3616_v49 = vand.u32 4294901760, %v3597_v41  ;;  %v233_v51 = vand.u32 4294901760, %v232_v43  ;;  %v3622_v53 = vand.u32 4294901760, %v3609_v45  ;;  %v772_v54 = vsub.f32 %v3567_v25, %v771_v46  ;;  %p3386_p12 = scmp.ne.s32.totalorder %s3013_s12, %s3385_s13  ;;  %p3391_p0 = scmp.lt.s32.totalorder %s3385_s13, %s3385_s13 }
  0x66   :  { %v226_v55 = vsub.f32 %v3571_v27, %v225_v47  ;;  %v238_v56 = vsub.f32 %v3575_v28, %v237_v48  ;;  %v761_v59 = vand.u32 4294901760, %v760_v52  ;;  %v765_v60 = vand.u32 4294901760, %v3590_v38 }
  0x67   :  { %v198_v57 = vsub.f32 %v3597_v41, %v3616_v49  ;;  %v3030_v58 = vpack.c.bf16 %v233_v51, %v221_v50  ;;  %3253 = vset.pattern.permute.xlu0 %v3427_v61  ;;  %v209_v62 = vsub.f32 %v3609_v45, %v3622_v53  ;;  %v773_v63 = vand.u32 4294901760, %v772_v54  ;;  %p3392_p1 = por %p3391_p0, %p3390_p13 }
  0x68   :  { %v227_v1 = vand.u32 4294901760, %v226_v55  ;;  %v239_v2 = vand.u32 4294901760, %v238_v56  ;;  %3254 = vset.pattern.permute.xlu1 %v3427_v61  ;;  %1288 = vperm.xlu0 %3253, %v3563_v23   ;;  %v766_v4 = vsub.f32 %v3590_v38, %v765_v60  ;;  %v777_v5 = vand.u32 4294901760, %v3592_v39 }
  0x69   :  { %v199_v3 = vand.u32 4294901760, %v198_v57  ;;  %3031 = vmatprep.subr.bf16.mxu0 %v3030_v58  ;;  %1292 = vperm.xlu1 %3254, %v3578_v32   ;;  %v3054_v6 = vpack.c.bf16 %v773_v63, %v761_v59  ;;  %v3034_v8 = vpack.c.bf16 %v3559_v20, %v3557_v19  ;;  %v210_v9 = vand.u32 4294901760, %v209_v62  ;;  %p3393_p2 = pnand %p3392_p1, %p3386_p12 }
  0x6a   :  { %v3032_v7 = vpack.c.bf16 %v239_v2, %v227_v1  ;;  %v767_v10 = vand.u32 4294901760, %v766_v4  ;;  %v778_v11 = vsub.f32 %v3592_v39, %v777_v5  ;;  %v3058_v13 = vpack.c.bf16 %v3567_v25, %v3561_v21 }
  0x6b   :  { %200 = vmatmul.mubr.f32.vlgmr.msra.gmra.mrb[0].mxu0 %v199_v3  ;;  %740 = vmatmul.mubr.f32.vlgmr.msra.gmra.mrb[0].mxu1 %v199_v3  ;;  %v3428_v14 = vmov 4   ;;  %v3036_v16 = vpack.c.bf16 %v3575_v28, %v3571_v27  ;;  %v3060_v17 = vpack.c.bf16 %v3592_v39, %v3590_v38  ;;  %v3429_v22 = vmov 5  }
  0x6c   :  { %205 = vmatprep.mubr.f32.mxu0 %v4597_v0  ;;  %745 = vmatprep.mubr.f32.mxu1 %v4597_v0  ;;  %v779_v12 = vand.u32 4294901760, %v778_v11  ;;  %v3042_v29 = vpack.c.bf16 %v231_v36, %v219_v35  ;;  %v3066_v30 = vpack.c.bf16 %v771_v46, %v759_v44  ;;  %v3044_v19 = vpack.c.bf16 %v237_v48, %v225_v47 }
  0x6d   :  { %3055 = vmatprep.subr.bf16.mxu1 %v3054_v6  ;;  %3033 = vmatpush1.bf16.msra.mxu0 %v3032_v7  ;;  %v3430_v20 = vmov 6   ;;  %v3068_v21 = vpack.c.bf16 %v777_v5, %v765_v60  ;;  %v3431_v25 = vmov 8   ;;  %v3435_v27 = vmov 1  }
  0x6e   :  { %3035 = vmatprep.subr.bf16.mxu0 %v3034_v8  ;;  %3255 = vset.pattern.permute.xlu1 %v3428_v14  ;;  %v3056_v15 = vpack.c.bf16 %v779_v12, %v767_v10 }
  0x6f   :  { %211 = vmatmul.mubr.f32.gmra.mrb[2].mxu0 %v210_v9  ;;  %751 = vmatmul.mubr.f32.gmra.mrb[2].mxu1 %v210_v9 }
  0x70   :  { %301 = vmatprep.mubr.f32.mxu0 %v4597_v0  ;;  %841 = vmatprep.mubr.f32.mxu1 %v4597_v0 }
  0x71   :  { %3057 = vmatpush1.bf16.msra.mxu1 %v3056_v15  ;;  %3256 = vset.pattern.permute.xlu0 %v3428_v14 }
  0x72   :  { %3059 = vmatprep.subr.bf16.mxu1 %v3058_v13  ;;  %1368 = vperm.xlu1 %3255, %v3563_v23  }
  0x73   :  { %303 = vmatmul.mubr.f32.vlgmr.msra.gmra.mrb[0].mxu0 %v3583_v33  ;;  %1372 = vperm.xlu0 %3256, %v3578_v32  }
  0x74   :  { %843 = vmatmul.mubr.f32.vlgmr.msra.gmra.mrb[0].mxu1 %v3583_v33  ;;  %308 = vmatprep.mubr.f32.mxu0 %v4597_v0 }
  0x75   :  { %848 = vmatprep.mubr.f32.mxu1 %v4597_v0  ;;  %3037 = vmatpush1.bf16.msra.mxu0 %v3036_v16 }
  0x76   :  { %3061 = vmatpush1.bf16.msra.mxu1 %v3060_v17  ;;  %3039 = vmatprep.subr.bf16.mxu0 %v3555_v18 }
  0x77   :  { %310 = vmatmul.mubr.f32.gmra.mrb[2].mxu0 %v3594_v40  ;;  %3063 = vmatprep.subr.bf16.mxu1 %v3565_v24 }
  0x78   :  { %850 = vmatmul.mubr.f32.gmra.mrb[2].mxu1 %v3594_v40  ;;  %388 = vmatprep.mubr.f32.mxu0 %v4597_v0 }
  0x79   :  { %928 = vmatprep.mubr.f32.mxu1 %v4597_v0  ;;  %3258 = vset.pattern.permute.xlu1 %v3429_v22 }
  0x7a   :  { %3257 = vset.pattern.permute.xlu0 %v3429_v22  ;;  %1452 = vperm.xlu1 %3258, %v3578_v32  }
  0x7b   :  { %391 = vmatmul.mubr.f32.vlgmr.msra.gmra.mrb[0].mxu0 %v3597_v41  ;;  %1448 = vperm.xlu0 %3257, %v3563_v23  }
  0x7c   :  { %931 = vmatmul.mubr.f32.vlgmr.msra.gmra.mrb[0].mxu1 %v3597_v41  ;;  %396 = vmatprep.mubr.f32.mxu0 %v4597_v0 }
  0x7d   :  { %936 = vmatprep.mubr.f32.mxu1 %v4597_v0  ;;  %3041 = vmatpush1.bf16.msra.mxu0 %v3569_v26 }
  0x7e   :  { %3065 = vmatpush1.bf16.msra.mxu1 %v3588_v37  ;;  %3043 = vmatprep.subr.bf16.mxu0 %v3042_v29 }
  0x7f   :  { %399 = vmatmul.mubr.f32.gmra.mrb[2].mxu0 %v3609_v45  ;;  %3067 = vmatprep.subr.bf16.mxu1 %v3066_v30 }
  0x80   :  { %939 = vmatmul.mubr.f32.gmra.mrb[2].mxu1 %v3609_v45  ;;  %473 = vmatprep.mubr.f32.mxu0 %v4597_v0 }
  0x81   :  { %1013 = vmatprep.mubr.f32.mxu1 %v4597_v0  ;;  %3259 = vset.pattern.permute.xlu1 %v3430_v20 }
  0x82   :  { %3260 = vset.pattern.permute.xlu0 %v3430_v20  ;;  %1528 = vperm.xlu1 %3259, %v3563_v23  }
  0x83   :  { %477 = vmatmul.mubr.f32.vlgmr.msra.gmra.mrb[0].mxu0 %v3616_v49  ;;  %1532 = vperm.xlu0 %3260, %v3578_v32  }
  0x84   :  { %1017 = vmatmul.mubr.f32.vlgmr.msra.gmra.mrb[0].mxu1 %v3616_v49  ;;  %482 = vmatprep.mubr.f32.mxu0 %v4597_v0 }
  0x85   :  { %1022 = vmatprep.mubr.f32.mxu1 %v4597_v0  ;;  %3045 = vmatpush1.bf16.msra.mxu0 %v3044_v19 }
  0x86   :  { %3069 = vmatpush1.bf16.msra.mxu1 %v3068_v21  ;;  %3047 = vmatprep.subr.bf16.mxu0 %v3555_v18  ;;  %v3432_v18 = vmov 9  }
  0x87   :  { %486 = vmatmul.mubr.f32.gmra.mrb[2].mxu0 %v3622_v53  ;;  %3071 = vmatprep.subr.bf16.mxu1 %v3565_v24  ;;  %v3433_v24 = vmov 10  }
  0x88   :  { %1026 = vmatmul.mubr.f32.gmra.mrb[2].mxu1 %v3622_v53  ;;  %568 = vmatprep.mubr.f32.mxu0 %v4597_v0 }
  0x89   :  { %1108 = vmatprep.mubr.f32.mxu1 %v4597_v0  ;;  %3262 = vset.pattern.permute.xlu1 %v3431_v25 }
  0x8a   :  { %3261 = vset.pattern.permute.xlu0 %v3431_v25  ;;  %1612 = vperm.xlu1 %3262, %v3578_v32  }
  0x8b   :  { %570 = vmatmul.mubr.f32.vlgmr.msra.gmra.mrb[0].mxu0 %v3583_v33  ;;  %1608 = vperm.xlu0 %3261, %v3563_v23  }
  0x8c   :  { %1110 = vmatmul.mubr.f32.vlgmr.msra.gmra.mrb[0].mxu1 %v3583_v33  ;;  %575 = vmatprep.mubr.f32.mxu0 %v4597_v0 }
  0x8d   :  { %1115 = vmatprep.mubr.f32.mxu1 %v4597_v0  ;;  %3049 = vmatpush1.bf16.msra.mxu0 %v3569_v26  ;;  %v3434_v26 = vmov 11  }
  0x8e   :  { %3073 = vmatpush1.bf16.msra.mxu1 %v3588_v37  ;;  %3263 = vset.pattern.permute.xlu1 %v3432_v18 }
  0x8f   :  { %577 = vmatmul.mubr.f32.gmra.mrb[2].mxu0 %v3594_v40  ;;  %3264 = vset.pattern.permute.xlu0 %v3432_v18 }
  0x90   :  { %1117 = vmatmul.mubr.f32.gmra.mrb[2].mxu1 %v3594_v40  ;;  %651 = vmatprep.mubr.f32.mxu0 %v4597_v0 }
  0x91   :  { %1191 = vmatprep.mubr.f32.mxu1 %v4597_v0  ;;  %1688 = vperm.xlu1 %3263, %v3563_v23  }
  0x92   :  { %1692 = vperm.xlu0 %3264, %v3578_v32  }
  0x93   :  { %653 = vmatmul.mubr.f32.vlgmr.msra.gmra.mrb[0].mxu0 %v3583_v33 }
  0x94   :  { %1193 = vmatmul.mubr.f32.vlgmr.msra.gmra.mrb[0].mxu1 %v3583_v33  ;;  %658 = vmatprep.mubr.f32.mxu0 %v4597_v0 }
  0x95   :  { %1198 = vmatprep.mubr.f32.mxu1 %v4597_v0  ;;  %3266 = vset.pattern.permute.xlu1 %v3433_v24 }
  0x96   :  { %3265 = vset.pattern.permute.xlu0 %v3433_v24  ;;  %1772 = vperm.xlu1 %3266, %v3578_v32  }
  0x97   :  { %660 = vmatmul.mubr.f32.gmra.mrb[2].mxu0 %v3594_v40  ;;  %1768 = vperm.xlu0 %3265, %v3563_v23  }
  0x98   :  { %1200 = vmatmul.mubr.f32.gmra.mrb[2].mxu1 %v3594_v40  ;;  %1971 = vmatprep.mubr.f32.mxu0 %v4597_v0 }
  0x99   :  { %2511 = vmatprep.mubr.f32.mxu1 %v4597_v0 }
  0x9a   :  { %3267 = vset.pattern.permute.xlu1 %v3434_v26 }
  0x9b   :  { %3268 = vset.pattern.permute.xlu0 %v3434_v26  ;;  %1848 = vperm.xlu1 %3267, %v3563_v23   ;;  %v1257_v26 = vld [vmem:[#allocation10] ss:$8 sm:$0xf] }
  0x9c   :  { %1852 = vperm.xlu0 %3268, %v3578_v32  }
  0x9f   :  { %3270 = vset.pattern.permute.xlu1 %v3435_v27 }
  0xa0   :  { %3269 = vset.pattern.permute.xlu0 %v3435_v27 }
  0xde   :  { %v112_v28 = vpop.permute.xlu0 %111 }
  0xdf   :  { %v3805_v48 = vpop.permute.xlu1 %1215 }
  0xe2   :  { %v117_v49 = vpop.permute.xlu0 %116 }
  0xe3   :  { %v3817_v53 = vpop.permute.xlu1 %1219 }
  0xe4   :  { %4643 = vst [vmem:[#allocation17_spill] sm:$0xff] %v3817_v53 }
  0xe7   :  { %v3827_v56 = vpop.permute.xlu0 %1288 }
  0xe8   :  { %v3825_v55 = vpop.permute.xlu1 %1292 }
  0xe9   :  { %4645 = vst [vmem:[#allocation19_spill] sm:$0xff] %v3825_v55 }
  0xf1   :  { %v3835_v57 = vpop.permute.xlu1 %1368 }
  0xf2   :  { %v3839_v58 = vpop.permute.xlu0 %1372 }
  0xf3   :  { %4646 = vst [vmem:[#allocation20_spill] sm:$0xff] %v3839_v58  ;;  %v1817_v58 = vld [vmem:[#allocation10 + $0x20] ss:$8 sm:$0xf] }
  0xf9   :  { %v3845_v59 = vpop.permute.xlu1 %1452 }
  0xfa   :  { %4647 = vst [vmem:[#allocation21_spill] sm:$0xff] %v3845_v59  ;;  %v3847_v60 = vpop.permute.xlu0 %1448 }
 0x101   :  { %v3856_v62 = vpop.permute.xlu1 %1528 }
 0x102   :  { %v3860_v63 = vpop.permute.xlu0 %1532 }
 0x103   :  { %4648 = vst [vmem:[#allocation22_spill] sm:$0xff] %v3860_v63 }
 0x109   :  { %v3869_v3 = vpop.permute.xlu1 %1612 }
 0x10a   :  { %4650 = vst [vmem:[#allocation24_spill] sm:$0xff] %v3869_v3  ;;  %v3873_v5 = vpop.permute.xlu0 %1608 }
 0x110   :  { %v3881_v6 = vpop.permute.xlu1 %1688 }
 0x111   :  { %v3885_v7 = vpop.permute.xlu0 %1692 }
 0x112   :  { %4652 = vst [vmem:[#allocation26_spill] sm:$0xff] %v3885_v7 }
 0x115   :  { %v3891_v8 = vpop.permute.xlu1 %1772 }
 0x116   :  { %4653 = vst [vmem:[#allocation27_spill] sm:$0xff] %v3891_v8  ;;  %v3893_v9 = vpop.permute.xlu0 %1768 }
 0x11a   :  { %v3901_v10 = vpop.permute.xlu1 %1848 }
 0x11b   :  { %4654 = vst [vmem:[#allocation28_spill] sm:$0xff] %v3901_v10  ;;  %v3905_v11 = vpop.permute.xlu0 %1852 }
 0x11c   :  { %4655 = vst [vmem:[#allocation29_spill] sm:$0xff] %v3905_v11 }
 0x166   :  { %v654_v31 = vpop.f32.mrb[0].mxu0 }
 0x167   :  { %v3122_v33 = vadd.f32 %v654_v31, %v112_v28  ;;  %v1194_v34 = vpop.f32.mrb[0].mxu1  ;;  %v656_v35 = vpop.f32.mrb[1].mxu0 }
 0x168   :  { %v3126_v36 = vadd.f32 %v1194_v34, %v112_v28  ;;  %v1196_v37 = vpop.f32.mrb[1].mxu1  ;;  %v3123_v44 = vadd.f32 %v656_v35, %v112_v28 }
 0x169   :  { %v3737_v38 = vmax.f32 %v3122_v33, 0.0  ;;  %v3127_v46 = vadd.f32 %v1196_v37, %v112_v28 }
 0x16a   :  { %v3739_v39 = vmax.f32 %v3126_v36, 0.0  ;;  %v661_v40 = vpop.f32.mrb[2].mxu0  ;;  %v3769_v45 = vmax.f32 %v3123_v44, 0.0 }
 0x16b   :  { %v1201_v41 = vpop.f32.mrb[2].mxu1  ;;  %v3741_v42 = vpop.f32.mrb[3].mxu0  ;;  %1230 = vrot.lane.b32.xlu1 %v3737_v38, %s3436_s4  ;;  %v3775_v47 = vmax.f32 %v3127_v46, 0.0  ;;  %v3124_v50 = vadd.f32 %v661_v40, %v117_v49 }
 0x16c   :  { %v3745_v43 = vpop.f32.mrb[3].mxu1  ;;  %1238 = vrot.lane.b32.xlu0 %v3739_v39, %s3436_s4  ;;  %v3128_v52 = vadd.f32 %v1201_v41, %v117_v49  ;;  %v3125_v61 = vadd.f32 %v3741_v42, %v117_v49 }
 0x16d   :  { %v3815_v51 = vmax.f32 %v3124_v50, 0.0  ;;  %v3129_v1 = vadd.f32 %v3745_v43, %v117_v49  ;;  %v1223_v49 = vmul.f32 %v3805_v48, %v3769_v45  ;;  %v1224_v50 = vmul.f32 %v3805_v48, %v3739_v39 }
 0x16e   :  { %v3823_v54 = vmax.f32 %v3128_v52, 0.0  ;;  %v3863_v2 = vmax.f32 %v3125_v61, 0.0 }
 0x16f   :  { %1311 = vrot.lane.b32.xlu1 %v3737_v38, %s3437_s29  ;;  %4642 = vst [vmem:[#allocation16_spill] sm:$0xff] %v3815_v51  ;;  %v3871_v4 = vmax.f32 %v3129_v1, 0.0 }
 0x170   :  { %1399 = vrot.lane.b32.xlu0 %v3739_v39, %s3438_s3  ;;  %4644 = vst [vmem:[#allocation18_spill] sm:$0xff] %v3823_v54  ;;  %4649 = vst [vmem:[#allocation23_spill] sm:$0xff] %v3863_v2 }
 0x171   :  { %4651 = vst [vmem:[#allocation25_spill] sm:$0xff] %v3871_v4 }
 0x173   :  { %1319 = vrot.lane.b32.xlu1 %v3739_v39, %s3437_s29 }
 0x174   :  { %1559 = vrot.lane.b32.xlu0 %v3739_v39, %s3439_s30 }
 0x177   :  { %1391 = vrot.lane.b32.xlu1 %v3737_v38, %s3438_s3 }
 0x178   :  { %1719 = vrot.lane.b32.xlu0 %v3739_v39, %s3440_s6 }
 0x17b   :  { %1471 = vrot.lane.b32.xlu1 %v3737_v38, %s3441_s7 }
 0x17c   :  { %1791 = vrot.lane.b32.xlu0 %v3737_v38, %s3442_s8 }
 0x17f   :  { %1479 = vrot.lane.b32.xlu1 %v3739_v39, %s3441_s7 }
 0x180   :  { %1799 = vrot.lane.b32.xlu0 %v3739_v39, %s3442_s8 }
 0x183   :  { %1551 = vrot.lane.b32.xlu1 %v3737_v38, %s3439_s30 }
 0x184   :  { %1234 = vrot.lane.b32.xlu0 %v3769_v45, %s3436_s4 }
 0x187   :  { %1631 = vrot.lane.b32.xlu1 %v3737_v38, %s3443_s9 }
 0x188   :  { %1242 = vrot.lane.b32.xlu0 %v3775_v47, %s3436_s4 }
 0x18b   :  { %1639 = vrot.lane.b32.xlu1 %v3739_v39, %s3443_s9 }
 0x18c   :  { %1395 = vrot.lane.b32.xlu0 %v3769_v45, %s3438_s3 }
 0x18f   :  { %1711 = vrot.lane.b32.xlu1 %v3737_v38, %s3440_s6 }
 0x190   :  { %1403 = vrot.lane.b32.xlu0 %v3775_v47, %s3438_s3 }
 0x193   :  { %1315 = vrot.lane.b32.xlu1 %v3769_v45, %s3437_s29 }
 0x194   :  { %1555 = vrot.lane.b32.xlu0 %v3769_v45, %s3439_s30 }
 0x197   :  { %1323 = vrot.lane.b32.xlu1 %v3775_v47, %s3437_s29 }
 0x198   :  { %1563 = vrot.lane.b32.xlu0 %v3775_v47, %s3439_s30 }
 0x19b   :  { %1475 = vrot.lane.b32.xlu1 %v3769_v45, %s3441_s7 }
 0x19c   :  { %1715 = vrot.lane.b32.xlu0 %v3769_v45, %s3440_s6 }
 0x19f   :  { %1483 = vrot.lane.b32.xlu1 %v3775_v47, %s3441_s7 }
 0x1a0   :  { %1723 = vrot.lane.b32.xlu0 %v3775_v47, %s3440_s6 }
 0x1a3   :  { %1635 = vrot.lane.b32.xlu1 %v3769_v45, %s3443_s9 }
 0x1a4   :  { %1795 = vrot.lane.b32.xlu0 %v3769_v45, %s3442_s8 }
 0x1a7   :  { %1643 = vrot.lane.b32.xlu1 %v3775_v47, %s3443_s9 }
 0x1a8   :  { %1803 = vrot.lane.b32.xlu0 %v3775_v47, %s3442_s8 }
 0x1ab   :  { %1232 = vrot.lane.b32.xlu1 %v3815_v51, %s3436_s4 }
 0x1ac   :  { %1313 = vrot.lane.b32.xlu0 %v3815_v51, %s3437_s29 }
 0x1af   :  { %1240 = vrot.lane.b32.xlu1 %v3823_v54, %s3436_s4 }
 0x1b0   :  { %1321 = vrot.lane.b32.xlu0 %v3823_v54, %s3437_s29 }
 0x1b3   :  { %1393 = vrot.lane.b32.xlu1 %v3815_v51, %s3438_s3 }
 0x1b4   :  { %1473 = vrot.lane.b32.xlu0 %v3815_v51, %s3441_s7 }
 0x1b7   :  { %1401 = vrot.lane.b32.xlu1 %v3823_v54, %s3438_s3 }
 0x1b8   :  { %1481 = vrot.lane.b32.xlu0 %v3823_v54, %s3441_s7 }
 0x1bb   :  { %1553 = vrot.lane.b32.xlu1 %v3815_v51, %s3439_s30 }
 0x1bc   :  { %1633 = vrot.lane.b32.xlu0 %v3815_v51, %s3443_s9 }
 0x1bf   :  { %1561 = vrot.lane.b32.xlu1 %v3823_v54, %s3439_s30 }
 0x1c0   :  { %1641 = vrot.lane.b32.xlu0 %v3823_v54, %s3443_s9 }
 0x1c3   :  { %1713 = vrot.lane.b32.xlu1 %v3815_v51, %s3440_s6 }
 0x1c4   :  { %1317 = vrot.lane.b32.xlu0 %v3863_v2, %s3437_s29 }
 0x1c7   :  { %1721 = vrot.lane.b32.xlu1 %v3823_v54, %s3440_s6 }
 0x1c8   :  { %1325 = vrot.lane.b32.xlu0 %v3871_v4, %s3437_s29 }
 0x1cb   :  { %1793 = vrot.lane.b32.xlu1 %v3815_v51, %s3442_s8 }
 0x1cc   :  { %1477 = vrot.lane.b32.xlu0 %v3863_v2, %s3441_s7 }
 0x1cf   :  { %1801 = vrot.lane.b32.xlu1 %v3823_v54, %s3442_s8 }
 0x1d0   :  { %1485 = vrot.lane.b32.xlu0 %v3871_v4, %s3441_s7 }
 0x1d3   :  { %1236 = vrot.lane.b32.xlu1 %v3863_v2, %s3436_s4 }
 0x1d4   :  { %1637 = vrot.lane.b32.xlu0 %v3863_v2, %s3443_s9 }
 0x1d7   :  { %1244 = vrot.lane.b32.xlu1 %v3871_v4, %s3436_s4 }
 0x1d8   :  { %1645 = vrot.lane.b32.xlu0 %v3871_v4, %s3443_s9 }
 0x1db   :  { %1397 = vrot.lane.b32.xlu1 %v3863_v2, %s3438_s3 }
 0x1dc   :  { %1872 = vperm.xlu0 %3269, %v3563_v23   ;;  %v1246_v23 = vlaneseq }
 0x1dd   :  { %v1231_v12 = vpop.permute.xlu1 %1230 }
 0x1de   :  { %v1239_v13 = vpop.permute.xlu0 %1238  ;;  %v1260_v30 = vshrl.u32 %v1246_v23, 7  ;;  %v3936_v21 = vand.u32 127, %v1246_v23 }
 0x1df   :  { %1405 = vrot.lane.b32.xlu1 %v3871_v4, %s3438_s3 }
 0x1e0   :  { %v3938_v25 = vsub.s32 1, %v1260_v30  ;;  %v3940_v18 = vsub.s32 2, %v1260_v30  ;;  %vm1248_vm1 = vcmp.lt.s32.totalorder %v3936_v21, 17  ;;  %v3955_v33 = vsub.s32 0, %v1260_v30 }
 0x1e1   :  { %v3912_v14 = vpop.permute.xlu1 %1311  ;;  %v3957_v34 = vsub.s32 3, %v1260_v30  ;;  %vm1407_vm2 = vcmp.lt.s32.totalorder %v3936_v21, 15  ;;  %vm1567_vm3 = vcmp.lt.s32.totalorder %v3936_v21, 127  ;;  %vm1327_vm4 = vcmp.lt.s32.totalorder %v3936_v21, 16 }
 0x1e2   :  { %v3914_v15 = vpop.permute.xlu0 %1399  ;;  %v3950_v28 = vrot.slane %v1257_v26, %v3938_v25  ;;  %v3953_v31 = vrot.slane %v1257_v26, %v3940_v18  ;;  %v3970_v43 = vrot.slane %v1257_v26, %v3955_v33  ;;  %vm1727_vm5 = vcmp.lt.s32.totalorder %v3936_v21, 112 }
 0x1e3   :  { %1557 = vrot.lane.b32.xlu1 %v3863_v2, %s3439_s30  ;;  %v3973_v44 = vrot.slane %v1257_v26, %v3957_v34  ;;  %v1417_v26 = vld [vmem:[#allocation10 + $0x2] ss:$8 sm:$0xf]  ;;  %vm1487_vm6 = vcmp.lt.s32.totalorder %v3936_v21, 1  ;;  %v4104_v51 = vrot.slane %v1817_v58, %v3955_v33  ;;  %vm1647_vm7 = vcmp.lt.s32.totalorder %v3936_v21, 113 }
 0x1e4   :  { %4656 = vst [vmem:[#allocation30_spill] sm:$0xff] %v3950_v28  ;;  %4657 = vst [vmem:[#allocation31_spill] sm:$0xff] %v3953_v31  ;;  %vm1807_vm8 = vcmp.lt.s32.totalorder %v3936_v21, 111 }
 0x1e5   :  { %v3918_v16 = vpop.permute.xlu1 %1319  ;;  %4658 = vst [vmem:[#allocation32_spill] sm:$0xff] %v3970_v43  ;;  %4659 = vst [vmem:[#allocation33_spill] sm:$0xff] %v3973_v44 }
 0x1e6   :  { %v3920_v17 = vpop.permute.xlu0 %1559  ;;  %4669 = vst [vmem:[#allocation43_spill] sm:$0xff] %v4104_v51 }
 0x1e7   :  { %1565 = vrot.lane.b32.xlu1 %v3871_v4, %s3439_s30 }
 0x1e9   :  { %v3924_v22 = vpop.permute.xlu1 %1391 }
 0x1ea   :  { %v3926_v29 = vpop.permute.xlu0 %1719 }
 0x1eb   :  { %1717 = vrot.lane.b32.xlu1 %v3863_v2, %s3440_s6 }
 0x1ed   :  { %v3930_v19 = vpop.permute.xlu1 %1471 }
 0x1ee   :  { %v3932_v20 = vpop.permute.xlu0 %1791 }
 0x1ef   :  { %1725 = vrot.lane.b32.xlu1 %v3871_v4, %s3440_s6 }
 0x1f1   :  { %v3942_v24 = vpop.permute.xlu1 %1479 }
 0x1f2   :  { %v3944_v27 = vpop.permute.xlu0 %1799 }
 0x1f3   :  { %1797 = vrot.lane.b32.xlu1 %v3863_v2, %s3442_s8  ;;  %v1657_v2 = vld [vmem:[#allocation10 + $0x6] ss:$8 sm:$0xf] }
 0x1f5   :  { %v3959_v35 = vpop.permute.xlu1 %1551 }
 0x1f6   :  { %v1235_v36 = vpop.permute.xlu0 %1234 }
 0x1f7   :  { %v1251_v37 = vsel %vm1248_vm1, %v1235_v36, %v1239_v13  ;;  %v1253_v40 = vsel %vm1248_vm1, %v1231_v12, %v1235_v36  ;;  %1805 = vrot.lane.b32.xlu1 %v3871_v4, %s3442_s8 }
 0x1f8   :  { %v1280_v41 = vmul.f32 %v3950_v28, %v1253_v40  ;;  %v1281_v42 = vmul.f32 %v3953_v31, %v1251_v37  ;;  %v1222_v40 = vmul.f32 %v3805_v48, %v3737_v38 }
 0x1f9   :  { %v3975_v46 = vpop.permute.xlu1 %1631 }
 0x1fa   :  { %v1296_v52 = vmul.f32 %v3827_v56, %v1280_v41  ;;  %v1297_v61 = vmul.f32 %v3827_v56, %v1281_v42  ;;  %v1243_v1 = vpop.permute.xlu0 %1242  ;;  %v4004_v42 = vrot.slane %v1417_v26, %v3938_v25 }
 0x1fb   :  { %v1249_v23 = vsel %vm1248_vm1, %v1239_v13, %v1243_v1  ;;  %v1255_v30 = vsel %vm1248_vm1, %v1243_v1, %v1231_v12  ;;  %1876 = vperm.xlu1 %3270, %v3578_v32   ;;  %v1225_v12 = vmul.f32 %v3805_v48, %v3775_v47  ;;  %v4016_v48 = vrot.slane %v1417_v26, %v3955_v33 }
 0x1fc   :  { %v3989_v45 = vadd.f32 %v1296_v52, %v1223_v49  ;;  %v3991_v36 = vadd.f32 %v1297_v61, %v1224_v50  ;;  %v1279_v39 = vmul.f32 %v3970_v43, %v1255_v30  ;;  %v1282_v37 = vmul.f32 %v3973_v44, %v1249_v23  ;;  %4660 = vst [vmem:[#allocation34_spill] sm:$0xff] %v4004_v42  ;;  %v1577_v50 = vld [vmem:[#allocation10 + $0x5] ss:$8 sm:$0xf] }
 0x1fd   :  { %v3997_v13 = vpop.permute.xlu1 %1639  ;;  %v1337_v52 = vld [vmem:[#allocation10 + $0x1] ss:$8 sm:$0xf]  ;;  %v4007_v61 = vrot.slane %v1417_v26, %v3940_v18  ;;  %4662 = vst [vmem:[#allocation36_spill] sm:$0xff] %v4016_v48  ;;  %v4023_v23 = vrot.slane %v1417_v26, %v3957_v34  ;;  %v4045_v0 = vrot.slane %v1577_v50, %v3957_v34 }
 0x1fe   :  { %v1295_v32 = vmul.f32 %v3827_v56, %v1279_v39  ;;  %v1298_v41 = vmul.f32 %v3827_v56, %v1282_v37  ;;  %v1396_v49 = vpop.permute.xlu0 %1395  ;;  %v1737_v30 = vld [vmem:[#allocation10 + $0x7] ss:$8 sm:$0xf]  ;;  %v4029_v37 = vrot.slane %v1577_v50, %v3955_v33  ;;  %v4039_v26 = vrot.slane %v1337_v52, %v3940_v18 }
 0x1ff   :  { %4661 = vst [vmem:[#allocation35_spill] sm:$0xff] %v4007_v61  ;;  %v1410_v38 = vsel %vm1407_vm2, %v1396_v49, %v3914_v15  ;;  %v1412_v47 = vsel %vm1407_vm2, %v3924_v22, %v1396_v49  ;;  %4663 = vst [vmem:[#allocation37_spill] sm:$0xff] %v4023_v23  ;;  %v4032_v49 = vrot.slane %v1577_v50, %v3938_v25 }
 0x200   :  { %v4018_v56 = vadd.f32 %v1295_v32, %v1222_v40  ;;  %v4020_v1 = vadd.f32 %v1298_v41, %v1225_v12  ;;  %v4036_v40 = vrot.slane %v1337_v52, %v3938_v25  ;;  %v1497_v12 = vld [vmem:[#allocation10 + $0x3] ss:$8 sm:$0xf]  ;;  %4664 = vst [vmem:[#allocation38_spill] sm:$0xff] %v4039_v26  ;;  %v4042_v41 = vrot.slane %v1577_v50, %v3940_v18 }
 0x201   :  { %v4026_v39 = vpop.permute.xlu1 %1711  ;;  %v4048_v11 = vrot.slane %v1337_v52, %v3955_v33  ;;  %v4057_v7 = vrot.slane %v1337_v52, %v3957_v34  ;;  %v4060_v59 = vrot.slane %v1737_v30, %v3955_v33  ;;  %v4064_v50 = vrot.slane %v1737_v30, %v3938_v25 }
 0x202   :  { %v1404_v32 = vpop.permute.xlu0 %1403  ;;  %v4068_v63 = vrot.slane %v1497_v12, %v3938_v25  ;;  %v4074_v52 = vrot.slane %v1737_v30, %v3940_v18  ;;  %v4080_v55 = vrot.slane %v1497_v12, %v3955_v33  ;;  %v4083_v44 = vrot.slane %v1497_v12, %v3957_v34 }
 0x203   :  { %v1408_v8 = vsel %vm1407_vm2, %v3914_v15, %v1404_v32  ;;  %v1414_v3 = vsel %vm1407_vm2, %v1404_v32, %v3924_v22  ;;  %4665 = vst [vmem:[#allocation39_spill] sm:$0xff] %v4060_v59  ;;  %4666 = vst [vmem:[#allocation40_spill] sm:$0xff] %v4064_v50  ;;  %v4071_v15 = vrot.slane %v1497_v12, %v3940_v18 }
 0x204   :  { %4667 = vst [vmem:[#allocation41_spill] sm:$0xff] %v4074_v52  ;;  %v4077_v32 = vrot.slane %v1737_v30, %v3957_v34  ;;  %v1440_v43 = vmul.f32 %v4004_v42, %v1412_v47  ;;  %v1441_v4 = vmul.f32 %v4007_v61, %v1410_v38  ;;  %v1439_v42 = vmul.f32 %v4016_v48, %v1414_v3 }
 0x205   :  { %v1316_v22 = vpop.permute.xlu1 %1315  ;;  %v1442_v53 = vmul.f32 %v4023_v23, %v1408_v8 }
 0x206   :  { %4668 = vst [vmem:[#allocation42_spill] sm:$0xff] %v4077_v32  ;;  %v1556_v54 = vpop.permute.xlu0 %1555  ;;  %v1330_v31 = vsel %vm1327_vm4, %v1316_v22, %v3918_v16  ;;  %v1332_v30 = vsel %vm1327_vm4, %v3912_v14, %v1316_v22  ;;  %v4107_v22 = vrot.slane %v1817_v58, %v3938_v25 }
 0x207   :  { %v1570_v12 = vsel %vm1567_vm3, %v1556_v54, %v3920_v17  ;;  %v1572_v47 = vsel %vm1567_vm3, %v3959_v35, %v1556_v54  ;;  %v1360_v38 = vmul.f32 %v4036_v40, %v1332_v30  ;;  %v1361_v61 = vmul.f32 %v4039_v26, %v1330_v31 }
 0x208   :  { %4670 = vst [vmem:[#allocation44_spill] sm:$0xff] %v4107_v22  ;;  %v4112_v54 = vrot.slane %v1657_v2, %v3955_v33  ;;  %v4115_v31 = vrot.slane %v1657_v2, %v3938_v25  ;;  %v1456_v33 = vmul.f32 %v3847_v60, %v1440_v43  ;;  %v1457_v25 = vmul.f32 %v3847_v60, %v1441_v4 }
 0x209   :  { %v1376_v28 = vmul.f32 %v3835_v57, %v1360_v38  ;;  %v1377_v10 = vmul.f32 %v3835_v57, %v1361_v61  ;;  %v1324_v32 = vpop.permute.xlu1 %1323  ;;  %v4124_v38 = vrot.slane %v1817_v58, %v3940_v18  ;;  %v4127_v61 = vrot.slane %v1817_v58, %v3957_v34 }
 0x20a   :  { %v1564_v3 = vpop.permute.xlu0 %1563  ;;  %v1328_v8 = vsel %vm1327_vm4, %v3918_v16, %v1324_v32  ;;  %v1334_v30 = vsel %vm1327_vm4, %v1324_v32, %v3912_v14  ;;  %v1455_v16 = vmul.f32 %v3847_v60, %v1439_v42  ;;  %v1458_v14 = vmul.f32 %v3847_v60, %v1442_v53 }
 0x20b   :  { %4671 = vst [vmem:[#allocation45_spill] sm:$0xff] %v4124_v38  ;;  %4672 = vst [vmem:[#allocation46_spill] sm:$0xff] %v4127_v61  ;;  %v1384_v23 = vadd.f32 %v1376_v28, %v3989_v45  ;;  %v1385_v48 = vadd.f32 %v1377_v10, %v3991_v36  ;;  %v1359_v32 = vmul.f32 %v4048_v11, %v1334_v30 }
 0x20c   :  { %v1362_v26 = vmul.f32 %v4057_v7, %v1328_v8  ;;  %v1568_v58 = vsel %vm1567_vm3, %v3920_v17, %v1564_v3  ;;  %v1574_v4 = vsel %vm1567_vm3, %v1564_v3, %v3959_v35  ;;  %v1599_v45 = vmul.f32 %v4029_v37, %v1572_v47 }
 0x20d   :  { %v1464_v10 = vadd.f32 %v1456_v33, %v1384_v23  ;;  %v1465_v28 = vadd.f32 %v1457_v25, %v1385_v48  ;;  %v1476_v43 = vpop.permute.xlu1 %1475  ;;  %v1600_v53 = vmul.f32 %v4032_v49, %v1570_v12  ;;  %v1375_v60 = vmul.f32 %v3835_v57, %v1359_v32 }
 0x20e   :  { %v1378_v36 = vmul.f32 %v3835_v57, %v1362_v26  ;;  %v1716_v42 = vpop.permute.xlu0 %1715  ;;  %v1490_v48 = vsel %vm1487_vm6, %v1476_v43, %v3942_v24  ;;  %v1492_v23 = vsel %vm1487_vm6, %v3930_v19, %v1476_v43  ;;  %v1601_v12 = vmul.f32 %v4042_v41, %v1568_v58 }
 0x20f   :  { %v1730_v17 = vsel %vm1727_vm5, %v1716_v42, %v3926_v29  ;;  %v1732_v35 = vsel %vm1727_vm5, %v4026_v39, %v1716_v42  ;;  %v1602_v57 = vmul.f32 %v4045_v0, %v1574_v4  ;;  %v1383_v26 = vadd.f32 %v1375_v60, %v4018_v56 }
 0x210   :  { %v1386_v47 = vadd.f32 %v1378_v36, %v4020_v1  ;;  %v1520_v3 = vmul.f32 %v4068_v63, %v1492_v23  ;;  %v1521_v8 = vmul.f32 %v4071_v15, %v1490_v48  ;;  %v4168_v33 = vrot.slane %v1657_v2, %v3940_v18 }
 0x211   :  { %v1484_v30 = vpop.permute.xlu1 %1483  ;;  %v4171_v25 = vrot.slane %v1657_v2, %v3957_v34  ;;  %v1759_v32 = vmul.f32 %v4060_v59, %v1732_v35  ;;  %v1760_v58 = vmul.f32 %v4064_v50, %v1730_v17  ;;  %v1463_v56 = vadd.f32 %v1455_v16, %v1383_v26  ;;  %v4699_v50 = vld [vmem:[#allocation37_spill] sm:$0xff] }
 0x212   :  { %v1724_v4 = vpop.permute.xlu0 %1723  ;;  %v1466_v43 = vadd.f32 %v1458_v14, %v1386_v47  ;;  %v1615_v1 = vmul.f32 %v3873_v5, %v1599_v45  ;;  %v1616_v60 = vmul.f32 %v3873_v5, %v1600_v53  ;;  %v1536_v36 = vmul.f32 %v3856_v62, %v1520_v3  ;;  %v4714_v21 = vld [vmem:[#allocation46_spill] sm:$0xff] }
 0x213   :  { %v1537_v42 = vmul.f32 %v3856_v62, %v1521_v8  ;;  %v1617_v18 = vmul.f32 %v3873_v5, %v1601_v12  ;;  %v1618_v2 = vmul.f32 %v3873_v5, %v1602_v57  ;;  %v1488_v34 = vsel %vm1487_vm6, %v3942_v24, %v1484_v30 }
 0x214   :  { %v1494_v16 = vsel %vm1487_vm6, %v1484_v30, %v3930_v19  ;;  %v1544_v14 = vadd.f32 %v1536_v36, %v1464_v10  ;;  %v1522_v17 = vmul.f32 %v4083_v44, %v1488_v34  ;;  %v1775_v48 = vmul.f32 %v3893_v9, %v1759_v32 }
 0x215   :  { %v1545_v45 = vadd.f32 %v1537_v42, %v1465_v28  ;;  %v1519_v53 = vmul.f32 %v4080_v55, %v1494_v16  ;;  %v1636_v35 = vpop.permute.xlu1 %1635  ;;  %v1776_v23 = vmul.f32 %v3893_v9, %v1760_v58  ;;  %v1728_v26 = vsel %vm1727_vm5, %v3926_v29, %v1724_v4 }
 0x216   :  { %v1796_v5 = vpop.permute.xlu0 %1795  ;;  %v1650_v24 = vsel %vm1647_vm7, %v1636_v35, %v3997_v13  ;;  %v1652_v19 = vsel %vm1647_vm7, %v3975_v46, %v1636_v35  ;;  %v1538_v28 = vmul.f32 %v3856_v62, %v1522_v17  ;;  %v1734_v47 = vsel %vm1727_vm5, %v1724_v4, %v4026_v39 }
 0x217   :  { %v1535_v10 = vmul.f32 %v3856_v62, %v1519_v53  ;;  %v1810_v12 = vsel %vm1807_vm8, %v1796_v5, %v3944_v27  ;;  %v1812_v57 = vsel %vm1807_vm8, %v3932_v20, %v1796_v5  ;;  %v1624_v3 = vadd.f32 %v1616_v60, %v1544_v14  ;;  %v4673_v14 = vld [vmem:[#allocation42_spill] sm:$0xff] }
 0x218   :  { %v1679_v8 = vmul.f32 %v4112_v54, %v1652_v19  ;;  %v1546_v30 = vadd.f32 %v1538_v28, %v1466_v43  ;;  %v1680_v32 = vmul.f32 %v4115_v31, %v1650_v24  ;;  %v1625_v58 = vadd.f32 %v1617_v18, %v1545_v45  ;;  %v4674_v24 = vld [vmem:[#allocation28_spill] sm:$0xff] }
 0x219   :  { %v1543_v62 = vadd.f32 %v1535_v10, %v1463_v56  ;;  %v1644_v36 = vpop.permute.xlu1 %1643  ;;  %v1839_v42 = vmul.f32 %v4104_v51, %v1812_v57  ;;  %v1840_v34 = vmul.f32 %v4107_v22, %v1810_v12  ;;  %v1761_v18 = vmul.f32 %v4074_v52, %v1728_v26  ;;  %v4683_v22 = vld [vmem:[#allocation30_spill] sm:$0xff]  ;;  %v4687_v51 = vld [vmem:[#allocation31_spill] sm:$0xff] }
 0x21a   :  { %v1695_v16 = vmul.f32 %v3881_v6, %v1679_v8  ;;  %v1804_v29 = vpop.permute.xlu0 %1803  ;;  %v1648_v39 = vsel %vm1647_vm7, %v3997_v13, %v1644_v36  ;;  %v1696_v60 = vmul.f32 %v3881_v6, %v1680_v32  ;;  %v1762_v45 = vmul.f32 %v4673_v14, %v1734_v47  ;;  %v4688_v52 = vld [vmem:[#allocation18_spill] sm:$0xff] }
 0x21b   :  { %v1623_v4 = vadd.f32 %v1615_v1, %v1543_v62  ;;  %v1808_v43 = vsel %vm1807_vm8, %v3944_v27, %v1804_v29  ;;  %v1814_v56 = vsel %vm1807_vm8, %v1804_v29, %v3932_v20  ;;  %v1626_v53 = vadd.f32 %v1618_v2, %v1546_v30 }
 0x21c   :  { %v1654_v13 = vsel %vm1647_vm7, %v1644_v36, %v3975_v46  ;;  %v1704_v17 = vadd.f32 %v1696_v60, %v1624_v3  ;;  %v1681_v35 = vmul.f32 %v4168_v33, %v1648_v39  ;;  %v1855_v19 = vmul.f32 %v4674_v24, %v1839_v42 }
 0x21d   :  { %v1703_v1 = vadd.f32 %v1695_v16, %v1623_v4  ;;  %v1682_v5 = vmul.f32 %v4171_v25, %v1654_v13  ;;  %v4233_v27 = vpop.permute.xlu1 %1232  ;;  %v1856_v20 = vmul.f32 %v4674_v24, %v1840_v34  ;;  %v1841_v10 = vmul.f32 %v4124_v38, %v1808_v43 }
 0x21e   :  { %v1842_v2 = vmul.f32 %v4127_v61, %v1814_v56  ;;  %v1314_v28 = vpop.permute.xlu0 %1313  ;;  %v1784_v57 = vadd.f32 %v1776_v23, %v1704_v17  ;;  %v1697_v46 = vmul.f32 %v3881_v6, %v1681_v35  ;;  %v1777_v47 = vmul.f32 %v3893_v9, %v1761_v18 }
 0x21f   :  { %v1783_v12 = vadd.f32 %v1775_v48, %v1703_v1  ;;  %v1698_v26 = vmul.f32 %v3881_v6, %v1682_v5  ;;  %v1778_v3 = vmul.f32 %v3893_v9, %v1762_v45  ;;  %v1857_v34 = vmul.f32 %v4674_v24, %v1841_v10  ;;  %v3273_v45 = vld [vmem:[#allocation8] sm:$0xff] }
 0x220   :  { %v1705_v8 = vadd.f32 %v1697_v46, %v1625_v58  ;;  %v4245_v36 = vadd.f32 %v1856_v20, %v1784_v57  ;;  %v1858_v48 = vmul.f32 %v4674_v24, %v1842_v2  ;;  %v3444_v56 = vmov 2   ;;  %v1887_v2 = vld [vmem:[#allocation7] sm:$0xff] }
 0x221   :  { %v1706_v62 = vadd.f32 %v1698_v26, %v1626_v53  ;;  %v1241_v30 = vpop.permute.xlu1 %1240  ;;  %v4243_v32 = vadd.f32 %v1855_v19, %v1783_v12  ;;  %3271 = vset.pattern.permute.xlu1 %v3444_v56  ;;  %3272 = vset.pattern.permute.xlu0 %v3444_v56  ;;  %v3274_v53 = vld [vmem:[#allocation8 + $0x8] sm:$0xff]  ;;  %v1888_v12 = vld [vmem:[#allocation7 + $0x8] sm:$0xff]  ;;  %v1898_v26 = vsel %vm119_vm0, %v1887_v2, 0 }
 0x222   :  { %v1322_v42 = vpop.permute.xlu0 %1321  ;;  %v1785_v23 = vadd.f32 %v1777_v47, %v1705_v8  ;;  %1890 = vperm.xlu1 %3271, %v3273_v45   ;;  %1894 = vperm.xlu0 %3272, %v3274_v53   ;;  %v1901_v47 = vsel %vm119_vm0, %v1888_v12, 0 }
 0x223   :  { %v1786_v16 = vadd.f32 %v1778_v3, %v1706_v62  ;;  %v4279_v3 = vand.u32 4294901760, %v1898_v26  ;;  %v4281_v62 = vand.u32 4294901760, %v1901_v47 }
 0x224   :  { %v4251_v6 = vadd.f32 %v1857_v34, %v1785_v23 }
 0x225   :  { %v4249_v29 = vpop.permute.xlu1 %1393  ;;  %v4253_v39 = vadd.f32 %v1858_v48, %v1786_v16  ;;  %4678 = vst [vmem:[#allocation49_spill] sm:$0xff] %v4279_v3  ;;  %4679 = vst [vmem:[#allocation50_spill] sm:$0xff] %v4281_v62  ;;  %v4297_v2 = vsub.f32 %v1898_v26, %v4279_v3  ;;  %v4686_v3 = vld [vmem:[#allocation23_spill] sm:$0xff] }
 0x226   :  { %v4255_v9 = vpop.permute.xlu0 %1473 }
 0x227   :  { %4675 = vst [vmem:[#allocation28_spill] sm:$0xff] %v4253_v39  ;;  %4680 = vst [vmem:[#allocation51_spill] sm:$0xff] %v4297_v2 }
 0x229   :  { %v4257_v58 = vpop.permute.xlu1 %1401 }
 0x22a   :  { %v4261_v60 = vpop.permute.xlu0 %1481 }
 0x22d   :  { %v4259_v4 = vpop.permute.xlu1 %1553 }
 0x22e   :  { %v4265_v18 = vpop.permute.xlu0 %1633 }
 0x231   :  { %v4263_v43 = vpop.permute.xlu1 %1561 }
 0x232   :  { %v4271_v17 = vpop.permute.xlu0 %1641 }
 0x235   :  { %v4267_v13 = vpop.permute.xlu1 %1713 }
 0x236   :  { %v1318_v5 = vpop.permute.xlu0 %1317 }
 0x237   :  { %v1331_v34 = vsel %vm1327_vm4, %v1318_v5, %v1322_v42  ;;  %v1333_v48 = vsel %vm1327_vm4, %v1314_v28, %v1318_v5  ;;  %v4681_v5 = vld [vmem:[#allocation38_spill] sm:$0xff] }
 0x238   :  { %v1364_v12 = vmul.f32 %v4036_v40, %v1333_v48  ;;  %v1365_v61 = vmul.f32 %v4681_v5, %v1331_v34  ;;  %v4684_v48 = vld [vmem:[#allocation16_spill] sm:$0xff]  ;;  %v4685_v34 = vld [vmem:[#allocation17_spill] sm:$0xff] }
 0x239   :  { %v4269_v1 = vpop.permute.xlu1 %1721  ;;  %v1226_v5 = vmul.f32 %v4685_v34, %v4684_v48 }
 0x23a   :  { %v1326_v20 = vpop.permute.xlu0 %1325 }
 0x23b   :  { %v1329_v16 = vsel %vm1327_vm4, %v1322_v42, %v1326_v20  ;;  %v1335_v56 = vsel %vm1327_vm4, %v1326_v20, %v1314_v28  ;;  %v4307_v28 = vsub.f32 %v1901_v47, %v4281_v62  ;;  %v1228_v47 = vmul.f32 %v4685_v34, %v4688_v52  ;;  %v4689_v62 = vld [vmem:[#allocation25_spill] sm:$0xff] }
 0x23c   :  { %v1363_v20 = vmul.f32 %v4048_v11, %v1335_v56  ;;  %v1229_v11 = vmul.f32 %v4685_v34, %v4689_v62  ;;  %v4325_v56 = vand.u32 4294901760, %v4297_v2 }
 0x23d   :  { %v4273_v35 = vpop.permute.xlu1 %1793  ;;  %4682 = vst [vmem:[#allocation38_spill] sm:$0xff] %v4307_v28  ;;  %v4333_v52 = vand.u32 4294901760, %v4307_v28  ;;  %v4698_v28 = vld [vmem:[#allocation36_spill] sm:$0xff] }
 0x23e   :  { %4676 = vst [vmem:[#allocation47_spill] sm:$0xff] %v4273_v35  ;;  %v1478_v57 = vpop.permute.xlu0 %1477  ;;  %4691 = vst [vmem:[#allocation30_spill] sm:$0xff] %v4325_v56 }
 0x23f   :  { %4694 = vst [vmem:[#allocation16_spill] sm:$0xff] %v4333_v52 }
 0x241   :  { %v4275_v24 = vpop.permute.xlu1 %1801 }
 0x242   :  { %4677 = vst [vmem:[#allocation48_spill] sm:$0xff] %v4275_v24  ;;  %v1486_v23 = vpop.permute.xlu0 %1485 }
 0x245   :  { %v1237_v19 = vpop.permute.xlu1 %1236 }
 0x246   :  { %v1254_v45 = vsel %vm1248_vm1, %v4233_v27, %v1237_v19  ;;  %v1252_v53 = vsel %vm1248_vm1, %v1237_v19, %v1241_v30  ;;  %v1366_v19 = vmul.f32 %v4057_v7, %v1329_v16  ;;  %v1638_v7 = vpop.permute.xlu0 %1637  ;;  %v4690_v16 = vld [vmem:[#allocation32_spill] sm:$0xff] }
 0x247   :  { %v1284_v26 = vmul.f32 %v4683_v22, %v1254_v45  ;;  %v1285_v14 = vmul.f32 %v4687_v51, %v1252_v53  ;;  %v4693_v45 = vld [vmem:[#allocation33_spill] sm:$0xff] }
 0x249   :  { %v1245_v10 = vpop.permute.xlu1 %1244 }
 0x24a   :  { %v1256_v42 = vsel %vm1248_vm1, %v1245_v10, %v4233_v27  ;;  %v1250_v40 = vsel %vm1248_vm1, %v1241_v30, %v1245_v10  ;;  %v1227_v27 = vmul.f32 %v4685_v34, %v4686_v3  ;;  %v4692_v30 = vld [vmem:[#allocation20_spill] sm:$0xff]  ;;  %v1493_v3 = vsel %vm1487_vm6, %v4255_v9, %v1478_v57  ;;  %v4695_v34 = vld [vmem:[#allocation19_spill] sm:$0xff] }
 0x24b   :  { %v1283_v22 = vmul.f32 %v4690_v16, %v1256_v42  ;;  %v1380_v10 = vmul.f32 %v4692_v30, %v1364_v12  ;;  %v1286_v51 = vmul.f32 %v4693_v45, %v1250_v40  ;;  %v1381_v62 = vmul.f32 %v4692_v30, %v1365_v61 }
 0x24c   :  { %v1379_v48 = vmul.f32 %v4692_v30, %v1363_v20  ;;  %v1382_v42 = vmul.f32 %v4692_v30, %v1366_v19  ;;  %v1300_v16 = vmul.f32 %v4695_v34, %v1284_v26  ;;  %v1301_v12 = vmul.f32 %v4695_v34, %v1285_v14 }
 0x24d   :  { %v1398_v46 = vpop.permute.xlu1 %1397  ;;  %v1491_v20 = vsel %vm1487_vm6, %v1478_v57, %v4261_v60  ;;  %v1524_v19 = vmul.f32 %v4068_v63, %v1493_v3  ;;  %v1299_v14 = vmul.f32 %v4695_v34, %v1283_v22  ;;  %v1651_v57 = vsel %vm1647_vm7, %v1638_v7, %v4271_v17  ;;  %v4696_v22 = vld [vmem:[#allocation34_spill] sm:$0xff] }
 0x24e   :  { %v1411_v2 = vsel %vm1407_vm2, %v1398_v46, %v4257_v58  ;;  %v1413_v40 = vsel %vm1407_vm2, %v4249_v29, %v1398_v46  ;;  %v1489_v46 = vsel %vm1487_vm6, %v4261_v60, %v1486_v23  ;;  %v1302_v63 = vmul.f32 %v4695_v34, %v1286_v51  ;;  %v4697_v60 = vld [vmem:[#allocation35_spill] sm:$0xff]  ;;  %v4700_v51 = vld [vmem:[#allocation22_spill] sm:$0xff] }
 0x24f   :  { %v1444_v3 = vmul.f32 %v4696_v22, %v1413_v40  ;;  %v1445_v45 = vmul.f32 %v4697_v60, %v1411_v2  ;;  %v1309_v56 = vadd.f32 %v1301_v12, %v1228_v47  ;;  %v1540_v34 = vmul.f32 %v4700_v51, %v1524_v19 }
 0x250   :  { %v1526_v24 = vmul.f32 %v4083_v44, %v1489_v46  ;;  %v1684_v40 = vmul.f32 %v4115_v31, %v1651_v57 }
 0x251   :  { %v1406_v8 = vpop.permute.xlu1 %1405 }
 0x252   :  { %v1415_v61 = vsel %vm1407_vm2, %v1406_v8, %v4249_v29  ;;  %v1409_v26 = vsel %vm1407_vm2, %v4257_v58, %v1406_v8  ;;  %v1495_v29 = vsel %vm1487_vm6, %v1486_v23, %v4255_v9  ;;  %v1653_v58 = vsel %vm1647_vm7, %v4265_v18, %v1638_v7  ;;  %v1646_v8 = vpop.permute.xlu0 %1645 }
 0x253   :  { %v1443_v52 = vmul.f32 %v4698_v28, %v1415_v61  ;;  %v1525_v9 = vmul.f32 %v4071_v15, %v1491_v20  ;;  %v1308_v23 = vadd.f32 %v1300_v16, %v1227_v27  ;;  %v1446_v59 = vmul.f32 %v4699_v50, %v1409_v26  ;;  %v4701_v27 = vld [vmem:[#allocation21_spill] sm:$0xff] }
 0x254   :  { %v1523_v35 = vmul.f32 %v4080_v55, %v1495_v29  ;;  %v1307_v7 = vadd.f32 %v1299_v14, %v1226_v5  ;;  %v1683_v39 = vmul.f32 %v4112_v54, %v1653_v58  ;;  %v1649_v2 = vsel %vm1647_vm7, %v4271_v17, %v1646_v8 }
 0x255   :  { %v4304_v38 = vpop.permute.xlu1 %1557  ;;  %v1310_v15 = vadd.f32 %v1302_v63, %v1229_v11  ;;  %v1655_v50 = vsel %vm1647_vm7, %v1646_v8, %v4265_v18  ;;  %v1460_v47 = vmul.f32 %v4701_v27, %v1444_v3  ;;  %v1461_v55 = vmul.f32 %v4701_v27, %v1445_v45  ;;  %v4703_v63 = vld [vmem:[#allocation24_spill] sm:$0xff] }
 0x256   :  { %v1459_v44 = vmul.f32 %v4701_v27, %v1443_v52  ;;  %v1388_v5 = vadd.f32 %v1380_v10, %v1308_v23  ;;  %v1389_v54 = vadd.f32 %v1381_v62, %v1309_v56  ;;  %v1462_v31 = vmul.f32 %v4701_v27, %v1446_v59  ;;  %v4704_v23 = vld [vmem:[#allocation28_spill] sm:$0xff] }
 0x257   :  { %v1571_v17 = vsel %vm1567_vm3, %v4304_v38, %v4263_v43  ;;  %v1387_v11 = vadd.f32 %v1379_v48, %v1307_v7  ;;  %v1573_v18 = vsel %vm1567_vm3, %v4259_v4, %v4304_v38  ;;  %v1541_v59 = vmul.f32 %v4700_v51, %v1525_v9 }
 0x258   :  { %v1685_v10 = vmul.f32 %v4168_v33, %v1649_v2  ;;  %v1686_v52 = vmul.f32 %v4171_v25, %v1655_v50  ;;  %v1390_v62 = vadd.f32 %v1382_v42, %v1310_v15  ;;  %v1468_v12 = vadd.f32 %v1460_v47, %v1388_v5  ;;  %v4702_v25 = vld [vmem:[#allocation26_spill] sm:$0xff]  ;;  %v4706_v2 = vld [vmem:[#allocation47_spill] sm:$0xff]  ;;  %v4708_v50 = vld [vmem:[#allocation40_spill] sm:$0xff] }
 0x259   :  { %v1566_v53 = vpop.permute.xlu1 %1565  ;;  %v1469_v61 = vadd.f32 %v1461_v55, %v1389_v54  ;;  %v1467_v20 = vadd.f32 %v1459_v44, %v1387_v11  ;;  %v1604_v38 = vmul.f32 %v4032_v49, %v1571_v17  ;;  %v1542_v33 = vmul.f32 %v4700_v51, %v1526_v24  ;;  %v4707_v15 = vld [vmem:[#allocation39_spill] sm:$0xff]  ;;  %v4709_v47 = vld [vmem:[#allocation41_spill] sm:$0xff]  ;;  %v4710_v44 = vld [vmem:[#allocation42_spill] sm:$0xff] }
 0x25a   :  { %v1569_v16 = vsel %vm1567_vm3, %v4263_v43, %v1566_v53  ;;  %v1575_v56 = vsel %vm1567_vm3, %v1566_v53, %v4259_v4  ;;  %v1470_v14 = vadd.f32 %v1462_v31, %v1390_v62  ;;  %v1603_v43 = vmul.f32 %v4029_v37, %v1573_v18  ;;  %v4711_v18 = vld [vmem:[#allocation43_spill] sm:$0xff] }
 0x25b   :  { %v1873_v19 = vpop.permute.xlu0 %1872  ;;  %v1605_v26 = vmul.f32 %v4042_v41, %v1569_v16  ;;  %v1606_v4 = vmul.f32 %v4045_v0, %v1575_v56  ;;  %v1539_v53 = vmul.f32 %v4700_v51, %v1523_v35  ;;  %v1699_v42 = vmul.f32 %v4702_v25, %v1683_v39  ;;  %v4712_v56 = vld [vmem:[#allocation44_spill] sm:$0xff] }
 0x25c   :  { %v1700_v46 = vmul.f32 %v4702_v25, %v1684_v40  ;;  %v1701_v29 = vmul.f32 %v4702_v25, %v1685_v10  ;;  %v1702_v49 = vmul.f32 %v4702_v25, %v1686_v52  ;;  %v4420_v57 = vadd.f32 %v1873_v19, %v4243_v32  ;;  %v4705_v40 = vld [vmem:[#allocation48_spill] sm:$0xff]  ;;  %v4713_v10 = vld [vmem:[#allocation45_spill] sm:$0xff] }
 0x25d   :  { %v4367_v30 = vpop.permute.xlu1 %1717  ;;  %v4423_v37 = vadd.f32 %v1873_v19, %v4245_v36  ;;  %v1547_v41 = vadd.f32 %v1539_v53, %v1467_v20  ;;  %v1548_v0 = vadd.f32 %v1540_v34, %v1468_v12  ;;  %v1620_v35 = vmul.f32 %v4703_v63, %v1604_v38  ;;  %v4715_v38 = vld [vmem:[#allocation27_spill] sm:$0xff] }
 0x25e   :  { %v1549_v58 = vadd.f32 %v1541_v59, %v1469_v61  ;;  %v1619_v24 = vmul.f32 %v4703_v63, %v1603_v43  ;;  %v1550_v39 = vadd.f32 %v1542_v33, %v1470_v14  ;;  %v1621_v8 = vmul.f32 %v4703_v63, %v1605_v26 }
 0x25f   :  { %v1622_v22 = vmul.f32 %v4703_v63, %v1606_v4  ;;  %v1731_v32 = vsel %vm1727_vm5, %v4367_v30, %v4269_v1  ;;  %v1733_v36 = vsel %vm1727_vm5, %v4267_v13, %v4367_v30  ;;  %v4444_v9 = vadd.f32 %v1873_v19, %v4251_v6 }
 0x260   :  { %v4447_v51 = vadd.f32 %v1873_v19, %v4704_v23  ;;  %v1905_v34 = vand.u32 4294901760, %v4420_v57  ;;  %v1903_v7 = vand.u32 4294901760, %v4423_v37  ;;  %v1764_v27 = vmul.f32 %v4708_v50, %v1731_v32  ;;  %v4718_v32 = vld [vmem:[#allocation51_spill] sm:$0xff] }
 0x261   :  { %v1726_v28 = vpop.permute.xlu1 %1725  ;;  %v1627_v54 = vadd.f32 %v1619_v24, %v1547_v41  ;;  %v1628_v31 = vadd.f32 %v1620_v35, %v1548_v0  ;;  %v1629_v17 = vadd.f32 %v1621_v8, %v1549_v58  ;;  %v1630_v11 = vadd.f32 %v1622_v22, %v1550_v39  ;;  %v4716_v41 = vld [vmem:[#allocation29_spill] sm:$0xff] }
 0x262   :  { %v1729_v60 = vsel %vm1727_vm5, %v4269_v1, %v1726_v28  ;;  %v1735_v45 = vsel %vm1727_vm5, %v1726_v28, %v4267_v13  ;;  %v1763_v28 = vmul.f32 %v4707_v15, %v1733_v36  ;;  %v2445_v12 = vand.u32 4294901760, %v4444_v9 }
 0x263   :  { %v1765_v55 = vmul.f32 %v4709_v47, %v1729_v60  ;;  %v1766_v5 = vmul.f32 %v4710_v44, %v1735_v45  ;;  %v4480_v61 = vsub.f32 %v4423_v37, %v1903_v7  ;;  %v2443_v20 = vand.u32 4294901760, %v4447_v51  ;;  %v4719_v60 = vld [vmem:[#allocation16_spill] sm:$0xff]  ;;  %v4720_v45 = vld [vmem:[#allocation38_spill] sm:$0xff] }
 0x264   :  { %v1779_v19 = vmul.f32 %v4715_v38, %v1763_v28  ;;  %v1780_v14 = vmul.f32 %v4715_v38, %v1764_v27  ;;  %v1707_v4 = vadd.f32 %v1699_v42, %v1627_v54  ;;  %v1708_v53 = vadd.f32 %v1700_v46, %v1628_v31 }
 0x265   :  { %v1798_v48 = vpop.permute.xlu1 %1797  ;;  %v1781_v43 = vmul.f32 %v4715_v38, %v1765_v55  ;;  %v1782_v26 = vmul.f32 %v4715_v38, %v1766_v5  ;;  %v1709_v33 = vadd.f32 %v1701_v29, %v1629_v17  ;;  %v1710_v25 = vadd.f32 %v1702_v49, %v1630_v11 }
 0x266   :  { %v1811_v30 = vsel %vm1807_vm8, %v1798_v48, %v4705_v40  ;;  %v1813_v1 = vsel %vm1807_vm8, %v4706_v2, %v1798_v48  ;;  %v4474_v48 = vsub.f32 %v4420_v57, %v1905_v34  ;;  %v4492_v24 = vsub.f32 %v4444_v9, %v2445_v12 }
 0x267   :  { %v1843_v16 = vmul.f32 %v4711_v18, %v1813_v1  ;;  %v1844_v59 = vmul.f32 %v4712_v56, %v1811_v30  ;;  %v4495_v39 = vsub.f32 %v4447_v51, %v2443_v20  ;;  %v1996_v8 = vand.u32 4294901760, %v4480_v61 }
 0x268   :  { %v2002_v42 = vand.u32 4294901760, %v4474_v48  ;;  %v1787_v46 = vadd.f32 %v1779_v19, %v1707_v4  ;;  %v1788_v29 = vadd.f32 %v1780_v14, %v1708_v53  ;;  %v1789_v49 = vadd.f32 %v1781_v43, %v1709_v33 }
 0x269   :  { %v1806_v3 = vpop.permute.xlu1 %1805  ;;  %v1859_v0 = vmul.f32 %v4716_v41, %v1843_v16  ;;  %v1860_v63 = vmul.f32 %v4716_v41, %v1844_v59  ;;  %v1790_v22 = vadd.f32 %v1782_v26, %v1710_v25  ;;  %v1986_v23 = vsub.f32 %v4720_v45, %v4719_v60 }
 0x26a   :  { %v1809_v6 = vsel %vm1807_vm8, %v4705_v40, %v1806_v3  ;;  %v1815_v13 = vsel %vm1807_vm8, %v1806_v3, %v4706_v2  ;;  %v4717_v3 = vld [vmem:[#allocation30_spill] sm:$0xff]  ;;  %v1997_v1 = vsub.f32 %v4480_v61, %v1996_v8  ;;  %v2542_v15 = vand.u32 4294901760, %v4492_v24 }
 0x26b   :  { %v1845_v52 = vmul.f32 %v4713_v10, %v1809_v6  ;;  %v1846_v62 = vmul.f32 %v4714_v21, %v1815_v13  ;;  %v1975_v36 = vsub.f32 %v4718_v32, %v4717_v3  ;;  %v1867_v40 = vadd.f32 %v1859_v0, %v1787_v46 }
 0x26c   :  { %v1868_v9 = vadd.f32 %v1860_v63, %v1788_v29  ;;  %v2536_v6 = vand.u32 4294901760, %v4495_v39  ;;  %v2003_v13 = vsub.f32 %v4474_v48, %v2002_v42  ;;  %v1987_v44 = vand.u32 4294901760, %v1986_v23  ;;  %v4723_v23 = vld [vmem:[#allocation50_spill] sm:$0xff] }
 0x26d   :  { %v1861_v35 = vmul.f32 %v4716_v41, %v1845_v52  ;;  %v1862_v58 = vmul.f32 %v4716_v41, %v1846_v62  ;;  %v1976_v55 = vand.u32 4294901760, %v1975_v36  ;;  %v1998_v11 = vand.u32 4294901760, %v1997_v1 }
 0x26e   :  { %v2537_v18 = vsub.f32 %v4495_v39, %v2536_v6  ;;  %v2004_v16 = vand.u32 4294901760, %v2003_v13  ;;  %v2543_v56 = vsub.f32 %v4492_v24, %v2542_v15 }
 0x26f   :  { %v1869_v30 = vadd.f32 %v1861_v35, %v1789_v49  ;;  %v1870_v2 = vadd.f32 %v1862_v58, %v1790_v22 }
 0x270   :  { %v2544_v46 = vand.u32 4294901760, %v2543_v56 }
 0x27a   :  { %v1877_v51 = vpop.permute.xlu1 %1876 }
 0x27b   :  { %v1883_v28 = vadd.f32 %v1877_v51, %v1867_v40  ;;  %v1884_v50 = vadd.f32 %v1877_v51, %v1868_v9  ;;  %v1885_v27 = vadd.f32 %v1877_v51, %v1869_v30  ;;  %v1886_v47 = vadd.f32 %v1877_v51, %v1870_v2  ;;  %v93_v40 = vld [vmem:[#allocation2 + $0x20] sm:$0xff]  ;;  %v94_v9 = vld [vmem:[#allocation2 + $0x28] sm:$0xff]  ;;  %v95_v30 = vld [vmem:[#allocation2 + $0x30] sm:$0xff] }
 0x27c   :  { %v96_v2 = vld [vmem:[#allocation2 + $0x38] sm:$0xff]  ;;  %2995 = vst [vmem:[#allocation11 + $0x40] sm:$0xff] %v93_v40  ;;  %2996 = vst [vmem:[#allocation11 + $0x48] sm:$0xff] %v94_v9 }
 0x27d   :  { %v1909_v5 = vand.u32 4294901760, %v1883_v28  ;;  %v2449_v54 = vand.u32 4294901760, %v1885_v27  ;;  %v1907_v31 = vand.u32 4294901760, %v1884_v50  ;;  %v2447_v17 = vand.u32 4294901760, %v1886_v47  ;;  %2997 = vst [vmem:[#allocation11 + $0x50] sm:$0xff] %v95_v30  ;;  %2998 = vst [vmem:[#allocation11 + $0x58] sm:$0xff] %v96_v2 }
 0x27f   :  { %v2013_v59 = vsub.f32 %v1883_v28, %v1909_v5  ;;  %v2553_v10 = vsub.f32 %v1885_v27, %v2449_v54  ;;  %v4511_v52 = vpack.c.bf16 %v1907_v31, %v1903_v7  ;;  %v2007_v21 = vsub.f32 %v1884_v50, %v1907_v31 }
 0x280   :  { %v4513_v62 = vpack.c.bf16 %v2447_v17, %v2443_v20  ;;  %v2547_v38 = vsub.f32 %v1886_v47, %v2447_v17  ;;  %v4517_v19 = vpack.c.bf16 %v1909_v5, %v1905_v34  ;;  %v4519_v14 = vpack.c.bf16 %v2449_v54, %v2445_v12 }
 0x281   :  { %3075 = vmatprep.subr.bf16.mxu0 %v4511_v52  ;;  %v2008_v43 = vand.u32 4294901760, %v2007_v21  ;;  %v2014_v26 = vand.u32 4294901760, %v2013_v59  ;;  %v2554_v4 = vand.u32 4294901760, %v2553_v10  ;;  %v3082_v53 = vpack.c.bf16 %v2007_v21, %v4480_v61 }
 0x282   :  { %3099 = vmatprep.subr.bf16.mxu1 %v4513_v62  ;;  %3077 = vmatpush1.bf16.msra.mxu0 %v4517_v19  ;;  %v2548_v37 = vand.u32 4294901760, %v2547_v38  ;;  %v3106_v7 = vpack.c.bf16 %v2547_v38, %v4495_v39  ;;  %v3084_v57 = vpack.c.bf16 %v2013_v59, %v4474_v48  ;;  %v3108_v34 = vpack.c.bf16 %v2553_v10, %v4492_v24 }
 0x283   :  { %3101 = vmatpush1.bf16.msra.mxu1 %v4519_v14  ;;  %v2009_v12 = vsub.f32 %v2007_v21, %v2008_v43  ;;  %v2015_v20 = vsub.f32 %v2013_v59, %v2014_v26  ;;  %v2555_v33 = vsub.f32 %v2553_v10, %v2554_v4  ;;  %v3090_v25 = vpack.c.bf16 %v2008_v43, %v1996_v8 }
 0x284   :  { %v2549_v41 = vsub.f32 %v2547_v38, %v2548_v37  ;;  %v3114_v0 = vpack.c.bf16 %v2548_v37, %v2536_v6  ;;  %v3092_v61 = vpack.c.bf16 %v2014_v26, %v2002_v42  ;;  %v3116_v63 = vpack.c.bf16 %v2554_v4, %v2542_v15  ;;  %v4722_v42 = vld [vmem:[#allocation49_spill] sm:$0xff] }
 0x285   :  { %1977 = vmatmul.mubr.f32.vlgmr.msra.gmra.mrb[4].mxu0 %v1976_v55  ;;  %v2010_v35 = vand.u32 4294901760, %v2009_v12  ;;  %v2016_v58 = vand.u32 4294901760, %v2015_v20  ;;  %v2556_v29 = vand.u32 4294901760, %v2555_v33  ;;  %v4721_v39 = vmov 0.0  }
 0x286   :  { %2517 = vmatmul.mubr.f32.vlgmr.msra.gmra.mrb[4].mxu1 %v1976_v55  ;;  %1982 = vmatprep.mubr.f32.mxu0 %v4721_v39  ;;  %v2538_v48 = vand.u32 4294901760, %v2537_v18  ;;  %v2550_v24 = vand.u32 4294901760, %v2549_v41 }
 0x287   :  { %2522 = vmatprep.mubr.f32.mxu1 %v4721_v39  ;;  %v3078_v49 = vpack.c.bf16 %v2010_v35, %v1998_v11  ;;  %v3080_v22 = vpack.c.bf16 %v2016_v58, %v2004_v16  ;;  %v3104_v36 = vpack.c.bf16 %v2556_v29, %v2544_v46 }
 0x288   :  { %v3102_v8 = vpack.c.bf16 %v2550_v24, %v2538_v48 }
 0x289   :  { %1988 = vmatmul.mubr.f32.gmra.mrb[6].mxu0 %v1987_v44  ;;  %3079 = vmatprep.subr.bf16.mxu0 %v3078_v49 }
 0x28a   :  { %2528 = vmatmul.mubr.f32.gmra.mrb[6].mxu1 %v1987_v44  ;;  %3103 = vmatprep.subr.bf16.mxu1 %v3102_v8 }
 0x28b   :  { %3081 = vmatpush1.bf16.msra.mxu0 %v3080_v22  ;;  %3105 = vmatpush1.bf16.msra.mxu1 %v3104_v36 }
 0x28c   :  { %3083 = vmatprep.subr.bf16.mxu0 %v3082_v53  ;;  %3107 = vmatprep.subr.bf16.mxu1 %v3106_v7 }
 0x28d   :  { %2078 = vmatprep.mubr.f32.mxu0 %v4721_v39  ;;  %2618 = vmatprep.mubr.f32.mxu1 %v4721_v39 }
 0x28e   :  { %2080 = vmatmul.mubr.f32.vlgmr.msra.gmra.mrb[4].mxu0 %v4722_v42  ;;  %2620 = vmatmul.mubr.f32.vlgmr.msra.gmra.mrb[4].mxu1 %v4722_v42 }
 0x28f   :  { %3085 = vmatpush1.bf16.msra.mxu0 %v3084_v57  ;;  %3109 = vmatpush1.bf16.msra.mxu1 %v3108_v34 }
 0x290   :  { %3087 = vmatprep.subr.bf16.mxu0 %v4511_v52  ;;  %3111 = vmatprep.subr.bf16.mxu1 %v4513_v62 }
 0x291   :  { %2085 = vmatprep.mubr.f32.mxu0 %v4721_v39  ;;  %2625 = vmatprep.mubr.f32.mxu1 %v4721_v39 }
 0x292   :  { %2087 = vmatmul.mubr.f32.gmra.mrb[6].mxu0 %v4723_v23  ;;  %2627 = vmatmul.mubr.f32.gmra.mrb[6].mxu1 %v4723_v23 }
 0x293   :  { %2165 = vmatprep.mubr.f32.mxu0 %v4721_v39  ;;  %2705 = vmatprep.mubr.f32.mxu1 %v4721_v39 }
 0x296   :  { %2168 = vmatmul.mubr.f32.vlgmr.msra.gmra.mrb[4].mxu0 %v4718_v32  ;;  %2708 = vmatmul.mubr.f32.vlgmr.msra.gmra.mrb[4].mxu1 %v4718_v32  ;;  %v90_v32 = vld [vmem:[#allocation2 + $0x8] sm:$0xff] }
 0x297   :  { %3089 = vmatpush1.bf16.msra.mxu0 %v4517_v19  ;;  %3113 = vmatpush1.bf16.msra.mxu1 %v4519_v14  ;;  %2992 = vst [vmem:[#allocation11 + $0x8] sm:$0xff] %v90_v32 }
 0x298   :  { %3091 = vmatprep.subr.bf16.mxu0 %v3090_v25  ;;  %3115 = vmatprep.subr.bf16.mxu1 %v3114_v0 }
 0x299   :  { %2173 = vmatprep.mubr.f32.mxu0 %v4721_v39  ;;  %2713 = vmatprep.mubr.f32.mxu1 %v4721_v39 }
 0x29a   :  { %2176 = vmatmul.mubr.f32.gmra.mrb[6].mxu0 %v4720_v45  ;;  %2716 = vmatmul.mubr.f32.gmra.mrb[6].mxu1 %v4720_v45  ;;  %v92_v45 = vld [vmem:[#allocation2 + $0x18] sm:$0xff] }
 0x29b   :  { %2250 = vmatprep.mubr.f32.mxu0 %v4721_v39  ;;  %2790 = vmatprep.mubr.f32.mxu1 %v4721_v39  ;;  %2994 = vst [vmem:[#allocation11 + $0x18] sm:$0xff] %v92_v45 }
 0x29e   :  { %2254 = vmatmul.mubr.f32.vlgmr.msra.gmra.mrb[4].mxu0 %v4717_v3  ;;  %2794 = vmatmul.mubr.f32.vlgmr.msra.gmra.mrb[4].mxu1 %v4717_v3  ;;  %v89_v3 = vld [vmem:[#allocation2] sm:$0xff] }
 0x29f   :  { %3093 = vmatpush1.bf16.msra.mxu0 %v3092_v61  ;;  %3117 = vmatpush1.bf16.msra.mxu1 %v3116_v63  ;;  %2991 = vst [vmem:[#allocation11] sm:$0xff] %v89_v3 }
 0x2a0   :  { %3095 = vmatprep.subr.bf16.mxu0 %v4511_v52  ;;  %3119 = vmatprep.subr.bf16.mxu1 %v4513_v62 }
 0x2a1   :  { %2259 = vmatprep.mubr.f32.mxu0 %v4721_v39  ;;  %2799 = vmatprep.mubr.f32.mxu1 %v4721_v39  ;;  %v1891_v51 = vpop.permute.xlu1 %1890  ;;  %v1895_v55 = vpop.permute.xlu0 %1894 }
 0x2a2   :  { %2263 = vmatmul.mubr.f32.gmra.mrb[6].mxu0 %v4719_v60  ;;  %2803 = vmatmul.mubr.f32.gmra.mrb[6].mxu1 %v4719_v60  ;;  %v91_v60 = vld [vmem:[#allocation2 + $0x10] sm:$0xff] }
 0x2a3   :  { %2345 = vmatprep.mubr.f32.mxu0 %v4721_v39  ;;  %2885 = vmatprep.mubr.f32.mxu1 %v4721_v39  ;;  %2993 = vst [vmem:[#allocation11 + $0x10] sm:$0xff] %v91_v60 }
 0x2a6   :  { %2347 = vmatmul.mubr.f32.vlgmr.msra.gmra.mrb[4].mxu0 %v4722_v42  ;;  %2887 = vmatmul.mubr.f32.vlgmr.msra.gmra.mrb[4].mxu1 %v4722_v42 }
 0x2a7   :  { %3097 = vmatpush1.bf16.msra.mxu0 %v4517_v19  ;;  %3121 = vmatpush1.bf16.msra.mxu1 %v4519_v14 }
 0x2a8   :  { %2352 = vmatprep.mubr.f32.mxu0 %v4721_v39  ;;  %2892 = vmatprep.mubr.f32.mxu1 %v4721_v39 }
 0x2aa   :  { %2354 = vmatmul.mubr.f32.gmra.mrb[6].mxu0 %v4723_v23  ;;  %2894 = vmatmul.mubr.f32.gmra.mrb[6].mxu1 %v4723_v23 }
 0x2ab   :  { %2428 = vmatprep.mubr.f32.mxu0 %v4721_v39  ;;  %2968 = vmatprep.mubr.f32.mxu1 %v4721_v39 }
 0x2ae   :  { %2430 = vmatmul.mubr.f32.vlgmr.msra.gmra.mrb[4].mxu0 %v4722_v42  ;;  %2970 = vmatmul.mubr.f32.vlgmr.msra.gmra.mrb[4].mxu1 %v4722_v42 }
 0x2af   :  { %2435 = vmatprep.mubr.f32.mxu0 %v4721_v39  ;;  %2975 = vmatprep.mubr.f32.mxu1 %v4721_v39 }
 0x2b2   :  { %2437 = vmatmul.mubr.f32.gmra.mrb[6].mxu0 %v4723_v23  ;;  %2977 = vmatmul.mubr.f32.gmra.mrb[6].mxu1 %v4723_v23 }
 0x381   :  { %v2971_v1 = vpop.f32.mrb[4].mxu1  ;;  %v2431_v6 = vpop.f32.mrb[4].mxu0 }
 0x382   :  { %v3134_v13 = vadd.f32 %v2971_v1, %v1891_v51  ;;  %v3130_v15 = vadd.f32 %v2431_v6, %v1891_v51  ;;  %v2433_v28 = vpop.f32.mrb[5].mxu0  ;;  %v2973_v50 = vpop.f32.mrb[5].mxu1 }
 0x383   :  { %v3131_v27 = vadd.f32 %v2433_v28, %v1891_v51  ;;  %v3135_v47 = vadd.f32 %v2973_v50, %v1891_v51 }
 0x384   :  { %v2985_v44 = vmax.f32 %v3134_v13, 0.0  ;;  %v2983_v5 = vmax.f32 %v3130_v15, 0.0 }
 0x385   :  { %v2984_v54 = vmax.f32 %v3131_v27, 0.0  ;;  %v2986_v31 = vmax.f32 %v3135_v47, 0.0  ;;  %v2438_v17 = vpop.f32.mrb[6].mxu0  ;;  %v2978_v11 = vpop.f32.mrb[6].mxu1 }
 0x386   :  { %3001 = vst [vmem:[#allocation11 + $0x30] sm:$0xff] %v2985_v44  ;;  %2999 = vst [vmem:[#allocation11 + $0x20] sm:$0xff] %v2983_v5  ;;  %v3132_v18 = vadd.f32 %v2438_v17, %v1895_v55  ;;  %v3136_v16 = vadd.f32 %v2978_v11, %v1895_v55  ;;  %v2440_v56 = vpop.f32.mrb[7].mxu0  ;;  %v2980_v59 = vpop.f32.mrb[7].mxu1 }
 0x387   :  { %3000 = vst [vmem:[#allocation11 + $0x28] sm:$0xff] %v2984_v54  ;;  %3002 = vst [vmem:[#allocation11 + $0x38] sm:$0xff] %v2986_v31  ;;  %v3133_v10 = vadd.f32 %v2440_v56, %v1895_v55  ;;  %v3137_v52 = vadd.f32 %v2980_v59, %v1895_v55 }
 0x388   :  { %v2987_v21 = vmax.f32 %v3132_v18, 0.0  ;;  %v2989_v62 = vmax.f32 %v3136_v16, 0.0 }
 0x389   :  { %v2988_v38 = vmax.f32 %v3133_v10, 0.0  ;;  %v2990_v19 = vmax.f32 %v3137_v52, 0.0 }
 0x38a   :  { %3003 = vst [vmem:[#allocation11 + $0x60] sm:$0xff] %v2987_v21  ;;  %3005 = vst [vmem:[#allocation11 + $0x70] sm:$0xff] %v2989_v62 }
 0x38b   :  { %3004 = vst [vmem:[#allocation11 + $0x68] sm:$0xff] %v2988_v38  ;;  %3006 = vst [vmem:[#allocation11 + $0x78] sm:$0xff] %v2990_v19 }
 0x38c   :  { %3396 = shalt.err (!%p3393_p2)
}
 0x38d   :  { %s3397_s16 = scalar_lea.hbm %s4596_s5, 2048 }
 0x38e   :  { %p3398_p3 = scmp.ne.s32.totalorder %s4596_s5, %s3397_s16  ;;  %p3401_p4 = scmp.lt.u32.totalorder %s3397_s16, %s4596_s5 }
 0x390   :  { %p3403_p5 = pnand %p3401_p4, %p3398_p3 }
 0x392   :  { %3406 = shalt.err (!%p3403_p5)
}
 0x393   :  { %s3446_s10 = smov 1024   ;;  %s3447_s19 = smov 64  }
 0x394   :  { %3018 = dma.vmem_to_hbm [thread:$0]  %s3013_s12, 2048, %s4596_s5, [#allocation4], %s3446_s10, %s3446_s10, %s3447_s19  }
 0x395   :  { %3413 = dma.done.wait [#allocation4], 2048  }
 0x396   :  { %3414 = vsyncadd [#allocation4], 4294965248 }
 0x397   :  { %3022 = vsyncpa [#allocation3], 1 }
 0x398   :  { %3023 = vsyncpa [#allocation6], 1 }
 0x399   :  { %3024 = vsyncpa [#allocation9], 1 }
 0x39a   :  { %3025 = vsyncpa [#allocation4], 1 }

</bundles_post_ra>
